<compile_context>
chip_gen: v7x
topology: tpu7x:2x2x1
jax: 0.10.0
libtpu: 0.0.40
codegen_flags: <defaults>
</compile_context>

<pallas_src>
import functools

import jax
import jax.numpy as jnp
from jax.experimental import pallas as pl
from jax.experimental.pallas import tpu as pltpu

LANE = 128                                # class dim padded to this for lane-dense stores
VMEM_LIMIT_BYTES = 32 * 1024 * 1024       # explicit scoped-VMEM budget (fits v5e/v6e/v7x)
FUSED_VMEM_BUDGET = 20 * 1024 * 1024      # use the single fused kernel below this estimate
G_RESIDENT_BUDGET = 8 * 1024 * 1024       # keep g resident in VMEM below this (dbl-buffered)


def _round_up(x: int, m: int) -> int:
    return (x + m - 1) // m * m


# ----------------------------------------------------------------------------
# Kernel 1 (tiled path): fused MLP
#   h0 = W_L(... relu(W_1 x + b_1) ...) + b_L          (f32, lane-padded)
#   g0 = d^{-1/2} ⊙ h0                                  (bf16, carried state)
# Row-tiled over nodes; all weights stay resident (they are tiny).
# ----------------------------------------------------------------------------
def _mlp_kernel(x_ref, cs_ref, *refs, n_layers: int):
    h0_ref, g0_ref = refs[-2], refs[-1]
    wb = refs[:-2]
    h = x_ref[...].astype(jnp.float32)
    for li in range(n_layers):
        w = wb[2 * li][...]
        b = wb[2 * li + 1][...]
        h = jnp.dot(h, w, preferred_element_type=jnp.float32) + b
        if li < n_layers - 1:
            h = jnp.maximum(h, 0.0)        # ReLU on every layer except the last
    h0_ref[...] = h.astype(h0_ref.dtype)
    g0_ref[...] = (cs_ref[...] * h).astype(g0_ref.dtype)


def pallas_mlp(x, cs, params, *, tm: int):
    """x: (Npad, Fin) f32; cs: (Npad, 1) f32 = d^{-1/2}; params padded to LANE
    output columns on the last layer. Returns (h0 f32, g0 bf16), both (Npad, LANE)."""
    n, fin = x.shape
    assert n % tm == 0
    cp = params[-1][0].shape[1]
    n_layers = len(params)

    in_specs = [pl.BlockSpec((tm, fin), lambda i: (i, 0)),
                pl.BlockSpec((tm, 1), lambda i: (i, 0))]
    args = [x, cs]
    for w, b in params:
        in_specs.append(pl.BlockSpec(w.shape, lambda i: (0, 0)))
        in_specs.append(pl.BlockSpec(b.shape, lambda i: (0, 0)))
        args.extend([w, b])

    kern = functools.partial(_mlp_kernel, n_layers=n_layers)
    return pl.pallas_call(
        kern,
        out_shape=(jax.ShapeDtypeStruct((n, cp), jnp.float32),
                   jax.ShapeDtypeStruct((n, cp), jnp.bfloat16)),
        grid=(n // tm,),
        in_specs=in_specs,
        out_specs=(pl.BlockSpec((tm, cp), lambda i: (i, 0)),
                   pl.BlockSpec((tm, cp), lambda i: (i, 0))),
        compiler_params=pltpu.CompilerParams(
            dimension_semantics=("parallel",),
            vmem_limit_bytes=VMEM_LIMIT_BYTES),
    )(*args)


# ----------------------------------------------------------------------------
# Kernel 2 (tiled path): one APPNP propagation step on the carried state
#   g      = d^{-1/2} ⊙ h            (bf16, input)
#   acc    = A @ g                   (bf16 x bf16 MXU, f32 accumulate)
#   h_next = rs ⊙ acc + alpha*h0     (rs = (1-alpha) d^{-1/2})
#   output = cs ⊙ h_next (bf16)      for intermediate steps   (next g)
#          = h_next      (f32)       for the final step
# ----------------------------------------------------------------------------
def _prop_step_kernel(rs_ref, cs_ref, h0_ref, a_ref, g_ref, o_ref, acc_ref,
                      *, alpha: float, last_step: bool, tk: int, g_resident: bool):
    k = pl.program_id(1)

    if g_resident:
        start = pl.multiple_of(k * tk, tk)
        g = g_ref[pl.ds(start, tk), :]
    else:
        g = g_ref[...]

    part = jnp.dot(a_ref[...], g, preferred_element_type=jnp.float32)

    @pl.when(k == 0)
    def _():
        acc_ref[...] = part                # write directly; no zero-then-add pass

    @pl.when(k != 0)
    def _():
        acc_ref[...] += part

    @pl.when(k == pl.num_programs(1) - 1)
    def _():
        h_next = rs_ref[...] * acc_ref[...] + alpha * h0_ref[...]
        if last_step:
            o_ref[...] = h_next.astype(o_ref.dtype)
        else:
            o_ref[...] = (cs_ref[...] * h_next).astype(o_ref.dtype)


def pallas_appnp_step(a_bf16, g, rs, cs, h0, *, alpha: float, last_step: bool,
                      tm: int, tk: int):
    npad = a_bf16.shape[0]
    cp = h0.shape[1]
    assert npad % tm == 0 and npad % tk == 0

    # Keep g resident across the whole reduction when its (double-buffered,
    # bf16) footprint is small; otherwise stream (tk, cp) tiles.  Budgeted
    # against v7x's 64 MiB physical VMEM via VMEM_LIMIT_BYTES.
    g_resident = (npad * cp * 2) * 2 <= G_RESIDENT_BUDGET
    if g_resident:
        g_spec = pl.BlockSpec((npad, cp), lambda i, kk: (0, 0))
    else:
        g_spec = pl.BlockSpec((tk, cp), lambda i, kk: (kk, 0))

    out_dtype = jnp.float32 if last_step else jnp.bfloat16
    kern = functools.partial(_prop_step_kernel, alpha=alpha, last_step=last_step,
                             tk=tk, g_resident=g_resident)
    return pl.pallas_call(
        kern,
        out_shape=jax.ShapeDtypeStruct((npad, cp), out_dtype),
        grid=(npad // tm, npad // tk),
        in_specs=[
            pl.BlockSpec((tm, 1), lambda i, kk: (i, 0)),     # rs = (1-alpha) d^-1/2
            pl.BlockSpec((tm, 1), lambda i, kk: (i, 0)),     # cs = d^-1/2
            pl.BlockSpec((tm, cp), lambda i, kk: (i, 0)),    # h0
            pl.BlockSpec((tm, tk), lambda i, kk: (i, kk)),   # A (bf16, streamed)
            g_spec,                                          # g (bf16)
        ],
        out_specs=pl.BlockSpec((tm, cp), lambda i, kk: (i, 0)),
        scratch_shapes=[pltpu.VMEM((tm, cp), jnp.float32)],
        compiler_params=pltpu.CompilerParams(
            # row axis "parallel" -> megacore sharding on v7x; reduction innermost.
            dimension_semantics=("parallel", "arbitrary"),
            vmem_limit_bytes=VMEM_LIMIT_BYTES),
    )(rs, cs, h0, a_bf16, g)


# ----------------------------------------------------------------------------
# Kernel 3 (small-graph fast path): whole forward in one pallas_call.
# A, x, weights and all intermediates live in VMEM; the K propagation steps
# are Python-unrolled in-kernel (K is a small static int).
# ----------------------------------------------------------------------------
def _fused_kernel(x_ref, a_ref, rs_ref, cs_ref, *refs,
                  n_layers: int, k_steps: int, alpha: float):
    o_ref = refs[-1]
    wb = refs[:-1]

    h = x_ref[...].astype(jnp.float32)
    for li in range(n_layers):
        w = wb[2 * li][...]
        b = wb[2 * li + 1][...]
        h = jnp.dot(h, w, preferred_element_type=jnp.float32) + b
        if li < n_layers - 1:
            h = jnp.maximum(h, 0.0)
    h0 = h

    rs = rs_ref[...]
    cs = cs_ref[...]
    a = a_ref[...]                                  # (Npad, Npad) bf16, resident
    g = (cs * h0).astype(jnp.bfloat16)
    for step in range(k_steps):
        acc = jnp.dot(a, g, preferred_element_type=jnp.float32)
        h = rs * acc + alpha * h0
        if step < k_steps - 1:
            g = (cs * h).astype(jnp.bfloat16)
    o_ref[...] = h.astype(o_ref.dtype)


def pallas_appnp_fused(x, a_bf16, rs, cs, params, *, k: int, alpha: float):
    npad, fin = x.shape
    cp = params[-1][0].shape[1]
    n_layers = len(params)

    in_specs = [
        pl.BlockSpec((npad, fin), lambda i: (0, 0)),
        pl.BlockSpec((npad, npad), lambda i: (0, 0)),
        pl.BlockSpec((npad, 1), lambda i: (0, 0)),
        pl.BlockSpec((npad, 1), lambda i: (0, 0)),
    ]
    args = [x, a_bf16, rs, cs]
    for w, b in params:
        in_specs.append(pl.BlockSpec(w.shape, lambda i: (0, 0)))
        in_specs.append(pl.BlockSpec(b.shape, lambda i: (0, 0)))
        args.extend([w, b])

    kern = functools.partial(_fused_kernel, n_layers=n_layers, k_steps=k, alpha=alpha)
    return pl.pallas_call(
        kern,
        out_shape=jax.ShapeDtypeStruct((npad, cp), jnp.float32),
        grid=(1,),
        in_specs=in_specs,
        out_specs=pl.BlockSpec((npad, cp), lambda i: (0, 0)),
        compiler_params=pltpu.CompilerParams(
            dimension_semantics=("arbitrary",),
            vmem_limit_bytes=VMEM_LIMIT_BYTES),
    )(*args)


def _fused_vmem_bytes(npad, fin, cp, params):
    """Conservative VMEM estimate for the fused path (x2 for I/O buffering)."""
    a_b = npad * npad * 2
    x_b = npad * max(fin, LANE) * 4
    io_b = npad * cp * 4
    w_b = sum((w.size + b.size) * 4 for w, b in params)
    scale_b = 2 * npad * LANE * 4
    tmp_b = 4 * npad * cp * 4                       # h0, h, acc, g temporaries
    return 2 * (a_b + x_b + io_b + w_b + scale_b) + tmp_b


# ----------------------------------------------------------------------------
# Parameter init (deterministic; mimics nn.Linear.reset_parameters bounds)
# ----------------------------------------------------------------------------
def init_linear(key, fan_in, fan_out):
    kw, kb = jax.random.split(key)
    bound = 1.0 / jnp.sqrt(jnp.float32(fan_in))
    # stored as (Fin, Fout) so the kernel computes x @ w directly
    w = jax.random.uniform(kw, (fan_in, fan_out), jnp.float32, -bound, bound)
    b = jax.random.uniform(kb, (1, fan_out), jnp.float32, -bound, bound)
    return w, b


# ----------------------------------------------------------------------------
# Full APPNP forward
# ----------------------------------------------------------------------------
def appnp_forward(a_dense, x, params, *, k: int, alpha: float,
                  max_tile: int = 512, use_fused=None):
    n, fin = x.shape
    num_classes = params[-1][0].shape[1]
    cp = _round_up(num_classes, LANE)

    # Tile size: as large as possible (HBM-roofline friendly), clamped to Npad.
    tile = min(max_tile, _round_up(n, 128))
    npad = _round_up(n, tile)

    # ---- tiny glue: degree scales + padding (not the hot path) ----
    deg = jnp.maximum(jnp.sum(a_dense.astype(jnp.float32), axis=1), 1.0)
    dinv = deg ** -0.5
    rs = jnp.pad((1.0 - alpha) * dinv, (0, npad - n))[:, None]   # (Npad, 1) f32
    cs = jnp.pad(dinv, (0, npad - n))[:, None]                   # (Npad, 1) f32

    # bf16 adjacency (exact for 0/1 entries); padded directly in bf16 — the
    # padded f32 copy from the previous version is gone.
    a_bf16 = jnp.pad(a_dense.astype(jnp.bfloat16), ((0, npad - n), (0, npad - n)))
    x_p = jnp.pad(x.astype(jnp.float32), ((0, npad - n), (0, 0)))

    # pad the last Linear to LANE output columns (zeros) -> lane-dense stores
    w_last, b_last = params[-1]
    params_p = list(params[:-1]) + [
        (jnp.pad(w_last, ((0, 0), (0, cp - num_classes))),
         jnp.pad(b_last, ((0, 0), (0, cp - num_classes))))]

    if use_fused is None:
        use_fused = _fused_vmem_bytes(npad, fin, cp, params_p) <= FUSED_VMEM_BUDGET

    if use_fused:
        out = pallas_appnp_fused(x_p, a_bf16, rs, cs, params_p, k=k, alpha=alpha)
    else:
        h0, g = pallas_mlp(x_p, cs, params_p, tm=tile)           # h0 f32, g0 bf16
        if k == 0:
            out = h0
        else:
            for step in range(k):                                 # K static -> unrolled
                g = pallas_appnp_step(a_bf16, g, rs, cs, h0, alpha=alpha,
                                      last_step=(step == k - 1), tm=tile, tk=tile)
            out = g                                               # final step emits f32 h

    return out[:n, :num_classes]


# ----------------------------------------------------------------------------
# Pure-JAX reference (for validation)
# ----------------------------------------------------------------------------
def appnp_reference(a_dense, x, params, *, k: int, alpha: float):
    deg = jnp.maximum(jnp.sum(a_dense, axis=1), 1.0)
    dinv = deg ** -0.5
    a_norm = dinv[:, None] * a_dense * dinv[None, :]
    h = x
    n_layers = len(params)
    for idx, (w, b) in enumerate(params):
        h = h @ w + b
        if idx < n_layers - 1:
            h = jnp.maximum(h, 0.0)
    h0 = h
    for _ in range(k):
        h = (1.0 - alpha) * (a_norm @ h) + alpha * h0
    return h


if __name__ == "__main__":
    # config (matches module semantics: hidden_units=[32], num_classes=8,
    # k=3, alpha=0.1, dropout/edge_drop inactive at inference)
    N = 256
    IN_FEATS = 32
    HIDDEN = 32
    NUM_CLASSES = 8
    K = 3
    ALPHA = 0.1

    key = jax.random.PRNGKey(0)
    k_x, k_a, k_l0, k_l1 = jax.random.split(key, 4)

    # node features
    x = jax.random.normal(k_x, (N, IN_FEATS), jnp.float32)

    # random symmetric adjacency with self-loops (0/1 entries)
    a_rand = jax.random.bernoulli(k_a, 0.05, (N, N)).astype(jnp.float32)
    a_dense = jnp.minimum(a_rand + a_rand.T + jnp.eye(N, dtype=jnp.float32), 1.0)

    # layers: Linear(in_feats, hidden), Linear(hidden, num_classes)
    params = [
        init_linear(k_l0, IN_FEATS, HIDDEN),
        init_linear(k_l1, HIDDEN, NUM_CLASSES),
    ]

    ref = appnp_reference(a_dense, x, params, k=K, alpha=ALPHA)

    # Fused small-graph path (auto-selected at this size) ...
    out_fused = jax.block_until_ready(
        appnp_forward(a_dense, x, params, k=K, alpha=ALPHA))
    # ... and the tiled large-graph path, forced, so both kernels are exercised.
    out_tiled = jax.block_until_ready(
        appnp_forward(a_dense, x, params, k=K, alpha=ALPHA, use_fused=False))

    for out in (out_fused, out_tiled):
        assert out.shape == (N, NUM_CLASSES)
        assert bool(jnp.all(jnp.isfinite(out)))
        max_err = float(jnp.max(jnp.abs(out - ref)))
        assert max_err < 5e-2, f"max abs err {max_err}"
    print("KERNEL_OK")
</pallas_src>

<mosaic_0001>
module attributes {stable_mosaic.version = 11 : i64} {
  func.func @_fused_kernel(%arg0: i32, %arg1: memref<256x32xf32, #tpu.memory_space<vmem>>, %arg2: memref<256x256xbf16, #tpu.memory_space<vmem>>, %arg3: memref<256x1xf32, #tpu.memory_space<vmem>>, %arg4: memref<256x1xf32, #tpu.memory_space<vmem>>, %arg5: memref<32x32xf32, #tpu.memory_space<vmem>>, %arg6: memref<1x32xf32, #tpu.memory_space<vmem>>, %arg7: memref<32x128xf32, #tpu.memory_space<vmem>>, %arg8: memref<1x128xf32, #tpu.memory_space<vmem>>, %arg9: memref<256x128xf32, #tpu.memory_space<vmem>>) attributes {dimension_semantics = [#tpu.dimension_semantics<arbitrary>], iteration_bounds = array<i64: 1>, scalar_prefetch = 0 : i64, scratch_operands = 0 : i64, tpu.core_type = #tpu.core_type<tc>, window_params = [{pipeline_mode = #tpu.pipeline_mode<synchronous>, transform_indices = @transform_0, window_bounds = array<i64: 256, 32>}, {pipeline_mode = #tpu.pipeline_mode<synchronous>, transform_indices = @transform_1, window_bounds = array<i64: 256, 256>}, {pipeline_mode = #tpu.pipeline_mode<synchronous>, transform_indices = @transform_2, window_bounds = array<i64: 256, 1>}, {pipeline_mode = #tpu.pipeline_mode<synchronous>, transform_indices = @transform_3, window_bounds = array<i64: 256, 1>}, {pipeline_mode = #tpu.pipeline_mode<synchronous>, transform_indices = @transform_4, window_bounds = array<i64: 32, 32>}, {pipeline_mode = #tpu.pipeline_mode<synchronous>, transform_indices = @transform_5, window_bounds = array<i64: 1, 32>}, {pipeline_mode = #tpu.pipeline_mode<synchronous>, transform_indices = @transform_6, window_bounds = array<i64: 32, 128>}, {pipeline_mode = #tpu.pipeline_mode<synchronous>, transform_indices = @transform_7, window_bounds = array<i64: 1, 128>}, {pipeline_mode = #tpu.pipeline_mode<synchronous>, transform_indices = @transform_8, window_bounds = array<i64: 256, 128>}]} {
    %c0 = arith.constant 0 : index
    %c0_0 = arith.constant 0 : index
    %0 = vector.load %arg1[%c0, %c0_0] : memref<256x32xf32, #tpu.memory_space<vmem>>, vector<256x32xf32>
    %c0_1 = arith.constant 0 : index
    %c0_2 = arith.constant 0 : index
    %1 = vector.load %arg5[%c0_1, %c0_2] : memref<32x32xf32, #tpu.memory_space<vmem>>, vector<32x32xf32>
    %c0_3 = arith.constant 0 : index
    %c0_4 = arith.constant 0 : index
    %2 = vector.load %arg6[%c0_3, %c0_4] : memref<1x32xf32, #tpu.memory_space<vmem>>, vector<1x32xf32>
    %cst = arith.constant dense<0.000000e+00> : vector<256x32xf32>
    %3 = tpu.matmul %0, %1, %cst {dimension_numbers = #tpu.dot_dimension_numbers<[1], [0], [0], [1], [0, 0, 1, 1], [], []>} : vector<256x32xf32>, vector<32x32xf32>, vector<256x32xf32> -> vector<256x32xf32>
    %4 = vector.broadcast %2 : vector<1x32xf32> to vector<256x32xf32>
    %5 = arith.addf %3, %4 : vector<256x32xf32>
    %cst_5 = arith.constant 0.000000e+00 : f32
    %6 = vector.broadcast %cst_5 : f32 to vector<256x32xf32>
    %7 = arith.maximumf %5, %6 : vector<256x32xf32>
    %c0_6 = arith.constant 0 : index
    %c0_7 = arith.constant 0 : index
    %8 = vector.load %arg7[%c0_6, %c0_7] : memref<32x128xf32, #tpu.memory_space<vmem>>, vector<32x128xf32>
    %c0_8 = arith.constant 0 : index
    %c0_9 = arith.constant 0 : index
    %9 = vector.load %arg8[%c0_8, %c0_9] : memref<1x128xf32, #tpu.memory_space<vmem>>, vector<1x128xf32>
    %cst_10 = arith.constant dense<0.000000e+00> : vector<256x128xf32>
    %10 = tpu.matmul %7, %8, %cst_10 {dimension_numbers = #tpu.dot_dimension_numbers<[1], [0], [0], [1], [0, 0, 1, 1], [], []>} : vector<256x32xf32>, vector<32x128xf32>, vector<256x128xf32> -> vector<256x128xf32>
    %11 = vector.broadcast %9 : vector<1x128xf32> to vector<256x128xf32>
    %12 = arith.addf %10, %11 : vector<256x128xf32>
    %c0_11 = arith.constant 0 : index
    %c0_12 = arith.constant 0 : index
    %13 = vector.load %arg3[%c0_11, %c0_12] : memref<256x1xf32, #tpu.memory_space<vmem>>, vector<256x1xf32>
    %c0_13 = arith.constant 0 : index
    %c0_14 = arith.constant 0 : index
    %14 = vector.load %arg4[%c0_13, %c0_14] : memref<256x1xf32, #tpu.memory_space<vmem>>, vector<256x1xf32>
    %c0_15 = arith.constant 0 : index
    %c0_16 = arith.constant 0 : index
    %15 = vector.load %arg2[%c0_15, %c0_16] : memref<256x256xbf16, #tpu.memory_space<vmem>>, vector<256x256xbf16>
    %16 = vector.broadcast %14 : vector<256x1xf32> to vector<256x128xf32>
    %17 = arith.mulf %16, %12 : vector<256x128xf32>
    %18 = arith.truncf %17 : vector<256x128xf32> to vector<256x128xbf16>
    %cst_17 = arith.constant dense<0.000000e+00> : vector<256x128xf32>
    %19 = tpu.matmul %15, %18, %cst_17 {dimension_numbers = #tpu.dot_dimension_numbers<[1], [0], [0], [1], [0, 0, 1, 1], [], []>} : vector<256x256xbf16>, vector<256x128xbf16>, vector<256x128xf32> -> vector<256x128xf32>
    %20 = vector.broadcast %13 : vector<256x1xf32> to vector<256x128xf32>
    %21 = arith.mulf %20, %19 : vector<256x128xf32>
    %cst_18 = arith.constant 1.000000e-01 : f32
    %22 = vector.broadcast %cst_18 : f32 to vector<256x128xf32>
    %23 = arith.mulf %22, %12 : vector<256x128xf32>
    %24 = arith.addf %21, %23 : vector<256x128xf32>
    %25 = vector.broadcast %14 : vector<256x1xf32> to vector<256x128xf32>
    %26 = arith.mulf %25, %24 : vector<256x128xf32>
    %27 = arith.truncf %26 : vector<256x128xf32> to vector<256x128xbf16>
    %cst_19 = arith.constant dense<0.000000e+00> : vector<256x128xf32>
    %28 = tpu.matmul %15, %27, %cst_19 {dimension_numbers = #tpu.dot_dimension_numbers<[1], [0], [0], [1], [0, 0, 1, 1], [], []>} : vector<256x256xbf16>, vector<256x128xbf16>, vector<256x128xf32> -> vector<256x128xf32>
    %29 = vector.broadcast %13 : vector<256x1xf32> to vector<256x128xf32>
    %30 = arith.mulf %29, %28 : vector<256x128xf32>
    %cst_20 = arith.constant 1.000000e-01 : f32
    %31 = vector.broadcast %cst_20 : f32 to vector<256x128xf32>
    %32 = arith.mulf %31, %12 : vector<256x128xf32>
    %33 = arith.addf %30, %32 : vector<256x128xf32>
    %34 = vector.broadcast %14 : vector<256x1xf32> to vector<256x128xf32>
    %35 = arith.mulf %34, %33 : vector<256x128xf32>
    %36 = arith.truncf %35 : vector<256x128xf32> to vector<256x128xbf16>
    %cst_21 = arith.constant dense<0.000000e+00> : vector<256x128xf32>
    %37 = tpu.matmul %15, %36, %cst_21 {dimension_numbers = #tpu.dot_dimension_numbers<[1], [0], [0], [1], [0, 0, 1, 1], [], []>} : vector<256x256xbf16>, vector<256x128xbf16>, vector<256x128xf32> -> vector<256x128xf32>
    %38 = vector.broadcast %13 : vector<256x1xf32> to vector<256x128xf32>
    %39 = arith.mulf %38, %37 : vector<256x128xf32>
    %cst_22 = arith.constant 1.000000e-01 : f32
    %40 = vector.broadcast %cst_22 : f32 to vector<256x128xf32>
    %41 = arith.mulf %40, %12 : vector<256x128xf32>
    %42 = arith.addf %39, %41 : vector<256x128xf32>
    %c0_23 = arith.constant 0 : index
    %c0_24 = arith.constant 0 : index
    %43 = vector.load %arg9[%c0_23, %c0_24] : memref<256x128xf32, #tpu.memory_space<vmem>>, vector<256x128xf32>
    tpu.vector_store %arg9[%c0_23, %c0_24], %42 {strides = array<i32>} : memref<256x128xf32, #tpu.memory_space<vmem>>, vector<256x128xf32>,
    return
  }
  func.func @transform_0(%arg0: i32) -> (i32, i32) {
    %c0_i32 = arith.constant 0 : i32
    %c0_i32_0 = arith.constant 0 : i32
    %c0_i32_1 = arith.constant 0 : i32
    return %c0_i32, %c0_i32_0 : i32, i32
  }
  func.func @transform_1(%arg0: i32) -> (i32, i32) {
    %c0_i32 = arith.constant 0 : i32
    %c0_i32_0 = arith.constant 0 : i32
    %c0_i32_1 = arith.constant 0 : i32
    return %c0_i32, %c0_i32_0 : i32, i32
  }
  func.func @transform_2(%arg0: i32) -> (i32, i32) {
    %c0_i32 = arith.constant 0 : i32
    %c0_i32_0 = arith.constant 0 : i32
    %c0_i32_1 = arith.constant 0 : i32
    return %c0_i32, %c0_i32_0 : i32, i32
  }
  func.func @transform_3(%arg0: i32) -> (i32, i32) {
    %c0_i32 = arith.constant 0 : i32
    %c0_i32_0 = arith.constant 0 : i32
    %c0_i32_1 = arith.constant 0 : i32
    return %c0_i32, %c0_i32_0 : i32, i32
  }
  func.func @transform_4(%arg0: i32) -> (i32, i32) {
    %c0_i32 = arith.constant 0 : i32
    %c0_i32_0 = arith.constant 0 : i32
    %c0_i32_1 = arith.constant 0 : i32
    return %c0_i32, %c0_i32_0 : i32, i32
  }
  func.func @transform_5(%arg0: i32) -> (i32, i32) {
    %c0_i32 = arith.constant 0 : i32
    %c0_i32_0 = arith.constant 0 : i32
    %c0_i32_1 = arith.constant 0 : i32
    return %c0_i32, %c0_i32_0 : i32, i32
  }
  func.func @transform_6(%arg0: i32) -> (i32, i32) {
    %c0_i32 = arith.constant 0 : i32
    %c0_i32_0 = arith.constant 0 : i32
    %c0_i32_1 = arith.constant 0 : i32
    return %c0_i32, %c0_i32_0 : i32, i32
  }
  func.func @transform_7(%arg0: i32) -> (i32, i32) {
    %c0_i32 = arith.constant 0 : i32
    %c0_i32_0 = arith.constant 0 : i32
    %c0_i32_1 = arith.constant 0 : i32
    return %c0_i32, %c0_i32_0 : i32, i32
  }
  func.func @transform_8(%arg0: i32) -> (i32, i32) {
    %c0_i32 = arith.constant 0 : i32
    %c0_i32_0 = arith.constant 0 : i32
    %c0_i32_1 = arith.constant 0 : i32
    return %c0_i32, %c0_i32_0 : i32, i32
  }
}

</mosaic_0001>

<bundles_post_ra>
// kernel: tpu_custom_call.1
= control target key start
LH: loop header
LB: loop body
LE: loop exit
PB: predicated region body
PF: predicated region fallthrough
CT: control target
= control target key end

     0   :  { %vm74_vm0 = vcmask 261120   ;;  %v2994_v6 = vmov 0   ;;  %s4535_s0 = inlined_call_operand.vmem [shape: f32[256,32], index: 0, kind: input, shape index: {}]   ;;  %s4536_s1 = inlined_call_operand.vmem [shape: bf16[256,256], index: 1, kind: input, shape index: {}]   ;;  %s4537_s2 = inlined_call_operand.vmem [shape: f32[256,1], index: 2, kind: input, shape index: {}]   ;;  %s4538_s3 = inlined_call_operand.vmem [shape: f32[256,1], index: 3, kind: input, shape index: {}]   ;;  %s4539_s4 = inlined_call_operand.vmem [shape: f32[32,32], index: 4, kind: input, shape index: {}]   ;;  %s4540_s5 = inlined_call_operand.vmem [shape: f32[1,32], index: 5, kind: input, shape index: {}]   ;;  %s4541_s6 = inlined_call_operand.vmem [shape: f32[32,128], index: 6, kind: input, shape index: {}]   ;;  %s4542_s7 = inlined_call_operand.vmem [shape: f32[1,128], index: 7, kind: input, shape index: {}]   ;;  %s4543_s8 = inlined_call_operand.hbm [shape: f32[256,128], index: 8, kind: output, shape index: {}]  }
   0x1   :  { %v63_v0 = vld [vmem:[%s4539_s4] sm:$0xff]  ;;  %v64_v1 = vld [vmem:[%s4539_s4 + $0x8] sm:$0xff]  ;;  %v65_v2 = vld [vmem:[%s4539_s4 + $0x10] sm:$0xff]  ;;  %2889 = vset.pattern.permute.xlu0 %v2994_v6  ;;  %2890 = vset.pattern.permute.xlu1 %v2994_v6 }
   0x2   :  { %v2853_v3 = vpack.c.bf16 %v64_v1, %v63_v0  ;;  %v66_v4 = vld [vmem:[%s4539_s4 + $0x18] sm:$0xff]  ;;  %v31_v5 = vld [vmem:[%s4535_s0] sm:$0xff]  ;;  %v32_v8 = vld [vmem:[%s4535_s0 + $0x8] sm:$0xff] }
   0x3   :  { %v2857_v7 = vpack.c.bf16 %v66_v4, %v65_v2  ;;  %2749 = vmatprep.mubr.msk.f32.mxu0 %vm74_vm0, %v31_v5  ;;  %v33_v9 = vld [vmem:[%s4535_s0 + $0x10] sm:$0xff]  ;;  %v34_v10 = vld [vmem:[%s4535_s0 + $0x18] sm:$0xff]  ;;  %v35_v11 = vld [vmem:[%s4535_s0 + $0x20] sm:$0xff] }
   0x4   :  { %2854 = vmatprep.subr.bf16.mxu0 %v2853_v3  ;;  %v808_v12 = vld [vmem:[%s4538_s3 + $0x80] sm:$0xff]  ;;  %v429_v15 = vld [vmem:[%s4541_s6 + $0x8] sm:$0xff]  ;;  %v37_v18 = vld [vmem:[%s4535_s0 + $0x30] sm:$0xff] }
   0x5   :  { %2856 = vmatpush3.bf16.msra.mxu0 %v2853_v3  ;;  %v792_v13 = vld [vmem:[%s4538_s3] sm:$0xff]  ;;  %938 = vperm.xlu0 %2889, %v808_v12   ;;  %v36_v16 = vld [vmem:[%s4535_s0 + $0x28] sm:$0xff]  ;;  %v38_v19 = vld [vmem:[%s4535_s0 + $0x38] sm:$0xff] }
   0x6   :  { %2858 = vmatprep.subr.bf16.mxu0 %v2857_v7  ;;  %v428_v14 = vld [vmem:[%s4541_s6] sm:$0xff]  ;;  %858 = vperm.xlu1 %2890, %v792_v13   ;;  %v40_v21 = vld [vmem:[%s4535_s0 + $0x48] sm:$0xff] }
   0x7   :  { %v2861_v17 = vpack.c.bf16 %v429_v15, %v428_v14  ;;  %v39_v20 = vld [vmem:[%s4535_s0 + $0x40] sm:$0xff] }
   0x9   :  { %2860 = vmatpush3.bf16.msra.mxu0 %v2857_v7  ;;  %2862 = vmatprep.subr.bf16.mxu1 %v2861_v17 }
   0xa   :  { %2864 = vmatpush3.bf16.msra.mxu1 %v2861_v17 }
   0xc   :  { %2750 = vmatmul.mubr.msk.f32.vlgmr.msra.gmra.mrb[0].mxu0 %vm74_vm0, %v32_v8 }
   0xd   :  { %2752 = vmatprep.mubr.msk.f32.mxu0 %vm74_vm0, %v33_v9 }
  0x10   :  { %2753 = vmatmul.mubr.msk.f32.gmra.mrb[2].mxu0 %vm74_vm0, %v34_v10 }
  0x11   :  { %2755 = vmatprep.mubr.msk.f32.mxu0 %vm74_vm0, %v35_v11 }
  0x14   :  { %2756 = vmatmul.mubr.msk.f32.gmra.mrb[4].mxu0 %vm74_vm0, %v36_v16 }
  0x15   :  { %2758 = vmatprep.mubr.msk.f32.mxu0 %vm74_vm0, %v37_v18 }
  0x18   :  { %2759 = vmatmul.mubr.msk.f32.gmra.mrb[6].mxu0 %vm74_vm0, %v38_v19 }
  0x19   :  { %2761 = vmatprep.mubr.msk.f32.mxu0 %vm74_vm0, %v39_v20 }
  0x1a   :  { %13 = vsyncpa [#allocation3], 0  ;;  %v41_v22 = vld [vmem:[%s4535_s0 + $0x50] sm:$0xff]  ;;  %v42_v23 = vld [vmem:[%s4535_s0 + $0x58] sm:$0xff] }
  0x1b   :  { %v43_v24 = vld [vmem:[%s4535_s0 + $0x60] sm:$0xff]  ;;  %v44_v25 = vld [vmem:[%s4535_s0 + $0x68] sm:$0xff]  ;;  %v45_v26 = vld [vmem:[%s4535_s0 + $0x70] sm:$0xff] }
  0x1c   :  { %2762 = vmatmul.mubr.msk.f32.gmra.mrb[8].mxu0 %vm74_vm0, %v40_v21  ;;  %v46_v27 = vld [vmem:[%s4535_s0 + $0x78] sm:$0xff]  ;;  %v47_v28 = vld [vmem:[%s4535_s0 + $0x80] sm:$0xff]  ;;  %v48_v29 = vld [vmem:[%s4535_s0 + $0x88] sm:$0xff] }
  0x1d   :  { %2764 = vmatprep.mubr.msk.f32.mxu0 %vm74_vm0, %v41_v22  ;;  %v49_v30 = vld [vmem:[%s4535_s0 + $0x90] sm:$0xff]  ;;  %v50_v31 = vld [vmem:[%s4535_s0 + $0x98] sm:$0xff]  ;;  %v51_v32 = vld [vmem:[%s4535_s0 + $0xa0] sm:$0xff] }
  0x1e   :  { %v52_v33 = vld [vmem:[%s4535_s0 + $0xa8] sm:$0xff]  ;;  %v53_v34 = vld [vmem:[%s4535_s0 + $0xb0] sm:$0xff]  ;;  %v54_v35 = vld [vmem:[%s4535_s0 + $0xb8] sm:$0xff] }
  0x1f   :  { %v55_v36 = vld [vmem:[%s4535_s0 + $0xc0] sm:$0xff]  ;;  %v56_v37 = vld [vmem:[%s4535_s0 + $0xc8] sm:$0xff]  ;;  %v57_v38 = vld [vmem:[%s4535_s0 + $0xd0] sm:$0xff] }
  0x20   :  { %2765 = vmatmul.mubr.msk.f32.gmra.mrb[10].mxu0 %vm74_vm0, %v42_v23  ;;  %v58_v39 = vld [vmem:[%s4535_s0 + $0xd8] sm:$0xff]  ;;  %v59_v40 = vld [vmem:[%s4535_s0 + $0xe0] sm:$0xff]  ;;  %v60_v41 = vld [vmem:[%s4535_s0 + $0xe8] sm:$0xff] }
  0x21   :  { %2767 = vmatprep.mubr.msk.f32.mxu0 %vm74_vm0, %v43_v24  ;;  %v61_v42 = vld [vmem:[%s4535_s0 + $0xf0] sm:$0xff]  ;;  %v62_v43 = vld [vmem:[%s4535_s0 + $0xf8] sm:$0xff]  ;;  %v809_v44 = vld [vmem:[%s4538_s3 + $0x88] sm:$0xff] }
  0x22   :  { %v793_v45 = vld [vmem:[%s4538_s3 + $0x8] sm:$0xff]  ;;  %943 = vperm.xlu0 %2889, %v809_v44   ;;  %v810_v46 = vld [vmem:[%s4538_s3 + $0x90] sm:$0xff]  ;;  %v811_v47 = vld [vmem:[%s4538_s3 + $0x98] sm:$0xff] }
  0x23   :  { %863 = vperm.xlu1 %2890, %v793_v45   ;;  %v794_v48 = vld [vmem:[%s4538_s3 + $0x10] sm:$0xff]  ;;  %v795_v49 = vld [vmem:[%s4538_s3 + $0x18] sm:$0xff]  ;;  %v812_v50 = vld [vmem:[%s4538_s3 + $0xa0] sm:$0xff] }
  0x24   :  { %2768 = vmatmul.mubr.msk.f32.gmra.mrb[12].mxu0 %vm74_vm0, %v44_v25  ;;  %v813_v51 = vld [vmem:[%s4538_s3 + $0xa8] sm:$0xff]  ;;  %v796_v52 = vld [vmem:[%s4538_s3 + $0x20] sm:$0xff]  ;;  %v814_v54 = vld [vmem:[%s4538_s3 + $0xb0] sm:$0xff] }
  0x25   :  { %2770 = vmatprep.mubr.msk.f32.mxu0 %vm74_vm0, %v45_v26  ;;  %v797_v53 = vld [vmem:[%s4538_s3 + $0x28] sm:$0xff]  ;;  %v815_v55 = vld [vmem:[%s4538_s3 + $0xb8] sm:$0xff]  ;;  %v798_v56 = vld [vmem:[%s4538_s3 + $0x30] sm:$0xff] }
  0x26   :  { %948 = vperm.xlu0 %2889, %v810_v46   ;;  %v799_v57 = vld [vmem:[%s4538_s3 + $0x38] sm:$0xff]  ;;  %v430_v58 = vld [vmem:[%s4541_s6 + $0x10] sm:$0xff]  ;;  %v816_v61 = vld [vmem:[%s4538_s3 + $0xc0] sm:$0xff] }
  0x27   :  { %953 = vperm.xlu1 %2890, %v811_v47   ;;  %v431_v59 = vld [vmem:[%s4541_s6 + $0x18] sm:$0xff]  ;;  %v817_v62 = vld [vmem:[%s4538_s3 + $0xc8] sm:$0xff]  ;;  %v800_v63 = vld [vmem:[%s4538_s3 + $0x40] sm:$0xff] }
  0x28   :  { %2771 = vmatmul.mubr.msk.f32.gmra.mrb[14].mxu0 %vm74_vm0, %v46_v27  ;;  %v2865_v60 = vpack.c.bf16 %v431_v59, %v430_v58  ;;  %v801_v0 = vld [vmem:[%s4538_s3 + $0x48] sm:$0xff]  ;;  %v818_v1 = vld [vmem:[%s4538_s3 + $0xd0] sm:$0xff]  ;;  %v819_v2 = vld [vmem:[%s4538_s3 + $0xd8] sm:$0xff] }
  0x29   :  { %2773 = vmatprep.mubr.msk.f32.mxu0 %vm74_vm0, %v47_v28  ;;  %v802_v3 = vld [vmem:[%s4538_s3 + $0x50] sm:$0xff]  ;;  %v803_v4 = vld [vmem:[%s4538_s3 + $0x58] sm:$0xff]  ;;  %v820_v5 = vld [vmem:[%s4538_s3 + $0xe0] sm:$0xff] }
  0x2a   :  { %868 = vperm.xlu0 %2889, %v794_v48   ;;  %2866 = vmatprep.subr.bf16.mxu1 %v2865_v60  ;;  %v821_v6 = vld [vmem:[%s4538_s3 + $0xe8] sm:$0xff]  ;;  %v804_v7 = vld [vmem:[%s4538_s3 + $0x60] sm:$0xff]  ;;  %v822_v9 = vld [vmem:[%s4538_s3 + $0xf0] sm:$0xff] }
  0x2b   :  { %873 = vperm.xlu1 %2890, %v795_v49   ;;  %2868 = vmatpush3.bf16.msra.mxu1 %v2865_v60  ;;  %v805_v8 = vld [vmem:[%s4538_s3 + $0x68] sm:$0xff]  ;;  %v823_v10 = vld [vmem:[%s4538_s3 + $0xf8] sm:$0xff]  ;;  %v806_v11 = vld [vmem:[%s4538_s3 + $0x70] sm:$0xff] }
  0x2c   :  { %2774 = vmatmul.mubr.msk.f32.gmra.mrb[16].mxu0 %vm74_vm0, %v48_v29  ;;  %v807_v12 = vld [vmem:[%s4538_s3 + $0x78] sm:$0xff]  ;;  %v776_v13 = vld [vmem:[%s4537_s2 + $0x80] sm:$0xff]  ;;  %v777_v14 = vld [vmem:[%s4537_s2 + $0x88] sm:$0xff] }
  0x2d   :  { %2776 = vmatprep.mubr.msk.f32.mxu0 %vm74_vm0, %v49_v30  ;;  %v760_v15 = vld [vmem:[%s4537_s2] sm:$0xff]  ;;  %v761_v16 = vld [vmem:[%s4537_s2 + $0x8] sm:$0xff]  ;;  %v778_v17 = vld [vmem:[%s4537_s2 + $0x90] sm:$0xff] }
  0x2e   :  { %958 = vperm.xlu0 %2889, %v812_v50   ;;  %v779_v18 = vld [vmem:[%s4537_s2 + $0x98] sm:$0xff]  ;;  %v762_v19 = vld [vmem:[%s4537_s2 + $0x10] sm:$0xff]  ;;  %v780_v21 = vld [vmem:[%s4537_s2 + $0xa0] sm:$0xff] }
  0x2f   :  { %963 = vperm.xlu1 %2890, %v813_v51   ;;  %v763_v20 = vld [vmem:[%s4537_s2 + $0x18] sm:$0xff]  ;;  %v781_v22 = vld [vmem:[%s4537_s2 + $0xa8] sm:$0xff]  ;;  %v764_v23 = vld [vmem:[%s4537_s2 + $0x20] sm:$0xff] }
  0x30   :  { %2777 = vmatmul.mubr.msk.f32.gmra.mrb[18].mxu0 %vm74_vm0, %v50_v31  ;;  %v765_v24 = vld [vmem:[%s4537_s2 + $0x28] sm:$0xff]  ;;  %v782_v25 = vld [vmem:[%s4537_s2 + $0xb0] sm:$0xff]  ;;  %v783_v26 = vld [vmem:[%s4537_s2 + $0xb8] sm:$0xff] }
  0x31   :  { %2779 = vmatprep.mubr.msk.f32.mxu0 %vm74_vm0, %v51_v32  ;;  %v766_v27 = vld [vmem:[%s4537_s2 + $0x30] sm:$0xff]  ;;  %v767_v28 = vld [vmem:[%s4537_s2 + $0x38] sm:$0xff]  ;;  %v784_v29 = vld [vmem:[%s4537_s2 + $0xc0] sm:$0xff] }
  0x32   :  { %878 = vperm.xlu0 %2889, %v796_v52   ;;  %v785_v30 = vld [vmem:[%s4537_s2 + $0xc8] sm:$0xff]  ;;  %v768_v31 = vld [vmem:[%s4537_s2 + $0x40] sm:$0xff]  ;;  %v775_v44 = vld [vmem:[%s4537_s2 + $0x78] sm:$0xff] }
  0x33   :  { %883 = vperm.xlu1 %2890, %v797_v53   ;;  %v769_v32 = vld [vmem:[%s4537_s2 + $0x48] sm:$0xff]  ;;  %v3390_v45 = vld [vmem:[%s4540_s5] ss:$0 sm:$0xff] }
  0x34   :  { %2780 = vmatmul.mubr.msk.f32.gmra.mrb[20].mxu0 %vm74_vm0, %v52_v33  ;;  %v786_v33 = vld [vmem:[%s4537_s2 + $0xd0] sm:$0xff] }
  0x35   :  { %2782 = vmatprep.mubr.msk.f32.mxu0 %vm74_vm0, %v53_v34  ;;  %v787_v34 = vld [vmem:[%s4537_s2 + $0xd8] sm:$0xff] }
  0x36   :  { %968 = vperm.xlu0 %2889, %v814_v54  }
  0x37   :  { %973 = vperm.xlu1 %2890, %v815_v55  }
  0x38   :  { %2783 = vmatmul.mubr.msk.f32.gmra.mrb[22].mxu0 %vm74_vm0, %v54_v35  ;;  %v770_v35 = vld [vmem:[%s4537_s2 + $0x50] sm:$0xff] }
  0x39   :  { %2785 = vmatprep.mubr.msk.f32.mxu0 %vm74_vm0, %v55_v36  ;;  %v771_v36 = vld [vmem:[%s4537_s2 + $0x58] sm:$0xff] }
  0x3a   :  { %888 = vperm.xlu0 %2889, %v798_v56  }
  0x3b   :  { %893 = vperm.xlu1 %2890, %v799_v57  }
  0x3c   :  { %2786 = vmatmul.mubr.msk.f32.gmra.mrb[24].mxu0 %vm74_vm0, %v56_v37  ;;  %v788_v37 = vld [vmem:[%s4537_s2 + $0xe0] sm:$0xff] }
  0x3d   :  { %2788 = vmatprep.mubr.msk.f32.mxu0 %vm74_vm0, %v57_v38  ;;  %v789_v38 = vld [vmem:[%s4537_s2 + $0xe8] sm:$0xff] }
  0x3e   :  { %978 = vperm.xlu0 %2889, %v816_v61  }
  0x3f   :  { %983 = vperm.xlu1 %2890, %v817_v62  }
  0x40   :  { %2789 = vmatmul.mubr.msk.f32.gmra.mrb[26].mxu0 %vm74_vm0, %v58_v39  ;;  %v772_v39 = vld [vmem:[%s4537_s2 + $0x60] sm:$0xff] }
  0x41   :  { %2791 = vmatprep.mubr.msk.f32.mxu0 %vm74_vm0, %v59_v40  ;;  %v773_v40 = vld [vmem:[%s4537_s2 + $0x68] sm:$0xff] }
  0x42   :  { %898 = vperm.xlu0 %2889, %v800_v63  }
  0x43   :  { %903 = vperm.xlu1 %2890, %v801_v0  }
  0x44   :  { %2792 = vmatmul.mubr.msk.f32.gmra.mrb[28].mxu0 %vm74_vm0, %v60_v41  ;;  %v790_v41 = vld [vmem:[%s4537_s2 + $0xf0] sm:$0xff] }
  0x45   :  { %2794 = vmatprep.mubr.msk.f32.mxu0 %vm74_vm0, %v61_v42  ;;  %v791_v42 = vld [vmem:[%s4537_s2 + $0xf8] sm:$0xff] }
  0x46   :  { %988 = vperm.xlu0 %2889, %v818_v1  }
  0x47   :  { %993 = vperm.xlu1 %2890, %v819_v2  }
  0x48   :  { %2795 = vmatmul.mubr.msk.f32.gmra.mrb[30].mxu0 %vm74_vm0, %v62_v43  ;;  %v774_v43 = vld [vmem:[%s4537_s2 + $0x70] sm:$0xff] }
  0x4a   :  { %908 = vperm.xlu0 %2889, %v802_v3  }
  0x4b   :  { %913 = vperm.xlu1 %2890, %v803_v4  }
  0x4e   :  { %998 = vperm.xlu0 %2889, %v820_v5  }
  0x4f   :  { %1003 = vperm.xlu1 %2890, %v821_v6  }
  0x52   :  { %918 = vperm.xlu0 %2889, %v804_v7  }
  0x53   :  { %923 = vperm.xlu1 %2890, %v805_v8  }
  0x56   :  { %1008 = vperm.xlu0 %2889, %v822_v9  }
  0x57   :  { %1013 = vperm.xlu1 %2890, %v823_v10  }
  0x5a   :  { %928 = vperm.xlu0 %2889, %v806_v11  }
  0x5b   :  { %933 = vperm.xlu1 %2890, %v807_v12  }
  0x5e   :  { %1467 = vperm.xlu0 %2889, %v776_v13  }
  0x5f   :  { %1472 = vperm.xlu1 %2890, %v777_v14  }
  0x62   :  { %1387 = vperm.xlu0 %2889, %v760_v15  }
  0x63   :  { %1392 = vperm.xlu1 %2890, %v761_v16  }
  0x66   :  { %1477 = vperm.xlu0 %2889, %v778_v17  }
  0x67   :  { %1482 = vperm.xlu1 %2890, %v779_v18  }
  0x6a   :  { %1397 = vperm.xlu0 %2889, %v762_v19  }
  0x6b   :  { %1402 = vperm.xlu1 %2890, %v763_v20  }
  0x6e   :  { %1487 = vperm.xlu0 %2889, %v780_v21  }
  0x6f   :  { %1492 = vperm.xlu1 %2890, %v781_v22  }
  0x72   :  { %1407 = vperm.xlu0 %2889, %v764_v23  }
  0x73   :  { %1412 = vperm.xlu1 %2890, %v765_v24  }
  0x76   :  { %1497 = vperm.xlu0 %2889, %v782_v25  }
  0x77   :  { %1502 = vperm.xlu1 %2890, %v783_v26  }
  0x7a   :  { %1417 = vperm.xlu0 %2889, %v766_v27  }
  0x7b   :  { %1422 = vperm.xlu1 %2890, %v767_v28  }
  0x7e   :  { %1507 = vperm.xlu0 %2889, %v784_v29  }
  0x7f   :  { %1512 = vperm.xlu1 %2890, %v785_v30  }
  0x82   :  { %1427 = vperm.xlu0 %2889, %v768_v31  }
  0x83   :  { %1432 = vperm.xlu1 %2890, %v769_v32  }
  0x86   :  { %1517 = vperm.xlu0 %2889, %v786_v33  }
  0x87   :  { %1522 = vperm.xlu1 %2890, %v787_v34  }
  0x8a   :  { %1437 = vperm.xlu0 %2889, %v770_v35  }
  0x8b   :  { %1442 = vperm.xlu1 %2890, %v771_v36  }
  0x8e   :  { %1527 = vperm.xlu0 %2889, %v788_v37  }
  0x8f   :  { %1532 = vperm.xlu1 %2890, %v789_v38  }
  0x92   :  { %1447 = vperm.xlu0 %2889, %v772_v39  }
  0x93   :  { %1452 = vperm.xlu1 %2890, %v773_v40  }
  0x96   :  { %1537 = vperm.xlu0 %2889, %v790_v41  }
  0x97   :  { %1542 = vperm.xlu1 %2890, %v791_v42  }
  0x9a   :  { %1457 = vperm.xlu0 %2889, %v774_v43  }
  0x9b   :  { %1462 = vperm.xlu1 %2890, %v775_v44  }
  0xdf   :  { %v2751_v46 = vpop.f32.mrb[0].mxu0 }
  0xe0   :  { %v243_v47 = vadd.f32 %v2751_v46, %v3390_v45  ;;  %v237_v48 = vpop.f32.mrb[1].mxu0 }
  0xe1   :  { %v238_v49 = vadd.f32 %v3390_v45, %v237_v48 }
  0xe2   :  { %v397_v52 = vmax.f32 %v243_v47, 0.0 }
  0xe3   :  { %v396_v50 = vmax.f32 %v238_v49, 0.0  ;;  %v2754_v51 = vpop.f32.mrb[2].mxu0 }
  0xe4   :  { %v253_v53 = vadd.f32 %v2754_v51, %v3390_v45  ;;  %v247_v54 = vpop.f32.mrb[3].mxu0 }
  0xe5   :  { %v248_v55 = vadd.f32 %v3390_v45, %v247_v54  ;;  %2805 = vmatprep.mubr.msk.f32.mxu1 %vm74_vm0, %v396_v50 }
  0xe6   :  { %2806 = vmatmul.mubr.msk.f32.vlgmr.msra.gmra.mrb[0].mxu1 %vm74_vm0, %v397_v52  ;;  %v399_v58 = vmax.f32 %v253_v53, 0.0 }
  0xe7   :  { %v398_v56 = vmax.f32 %v248_v55, 0.0  ;;  %v2757_v57 = vpop.f32.mrb[4].mxu0 }
  0xe8   :  { %v263_v59 = vadd.f32 %v2757_v57, %v3390_v45  ;;  %v257_v60 = vpop.f32.mrb[5].mxu0 }
  0xe9   :  { %v258_v61 = vadd.f32 %v3390_v45, %v257_v60  ;;  %2808 = vmatprep.mubr.msk.f32.mxu1 %vm74_vm0, %v398_v56 }
  0xea   :  { %2809 = vmatmul.mubr.msk.f32.gmra.mrb[2].mxu1 %vm74_vm0, %v399_v58  ;;  %v401_v0 = vmax.f32 %v263_v59, 0.0 }
  0xeb   :  { %v400_v62 = vmax.f32 %v258_v61, 0.0  ;;  %v2760_v63 = vpop.f32.mrb[6].mxu0 }
  0xec   :  { %v273_v1 = vadd.f32 %v2760_v63, %v3390_v45  ;;  %v267_v2 = vpop.f32.mrb[7].mxu0 }
  0xed   :  { %v268_v3 = vadd.f32 %v3390_v45, %v267_v2  ;;  %2811 = vmatprep.mubr.msk.f32.mxu1 %vm74_vm0, %v400_v62 }
  0xee   :  { %2812 = vmatmul.mubr.msk.f32.gmra.mrb[4].mxu1 %vm74_vm0, %v401_v0  ;;  %v403_v6 = vmax.f32 %v273_v1, 0.0 }
  0xef   :  { %v402_v4 = vmax.f32 %v268_v3, 0.0  ;;  %v2763_v5 = vpop.f32.mrb[8].mxu0 }
  0xf0   :  { %v283_v7 = vadd.f32 %v2763_v5, %v3390_v45  ;;  %v277_v8 = vpop.f32.mrb[9].mxu0 }
  0xf1   :  { %v278_v9 = vadd.f32 %v3390_v45, %v277_v8  ;;  %2814 = vmatprep.mubr.msk.f32.mxu1 %vm74_vm0, %v402_v4 }
  0xf2   :  { %2815 = vmatmul.mubr.msk.f32.gmra.mrb[6].mxu1 %vm74_vm0, %v403_v6  ;;  %v405_v12 = vmax.f32 %v283_v7, 0.0 }
  0xf3   :  { %v404_v10 = vmax.f32 %v278_v9, 0.0  ;;  %v2766_v11 = vpop.f32.mrb[10].mxu0 }
  0xf4   :  { %v293_v13 = vadd.f32 %v2766_v11, %v3390_v45  ;;  %v287_v14 = vpop.f32.mrb[11].mxu0 }
  0xf5   :  { %v288_v15 = vadd.f32 %v3390_v45, %v287_v14  ;;  %2817 = vmatprep.mubr.msk.f32.mxu1 %vm74_vm0, %v404_v10 }
  0xf6   :  { %2818 = vmatmul.mubr.msk.f32.gmra.mrb[8].mxu1 %vm74_vm0, %v405_v12  ;;  %v407_v18 = vmax.f32 %v293_v13, 0.0 }
  0xf7   :  { %v406_v16 = vmax.f32 %v288_v15, 0.0  ;;  %v2769_v17 = vpop.f32.mrb[12].mxu0  ;;  %v3456_v15 = vpop.permute.xlu1 %858 }
  0xf8   :  { %v303_v19 = vadd.f32 %v2769_v17, %v3390_v45  ;;  %v297_v20 = vpop.f32.mrb[13].mxu0  ;;  %v3463_v17 = vld [vmem:[%s4536_s1 + $0x4] ss:$8 sps:$4 sm:$0xff]  }
  0xf9   :  { %v298_v21 = vadd.f32 %v3390_v45, %v297_v20  ;;  %2820 = vmatprep.mubr.msk.f32.mxu1 %vm74_vm0, %v406_v16  ;;  %v3458_v16 = vpop.permute.xlu0 %938  ;;  %1256 = vmatprep.mubr.bf16.mxu0 %v3463_v17 }
  0xfa   :  { %2821 = vmatmul.mubr.msk.f32.gmra.mrb[10].mxu1 %vm74_vm0, %v407_v18  ;;  %v409_v24 = vmax.f32 %v303_v19, 0.0  ;;  %4707 = vst [vmem:[#allocation5_spill] sm:$0xff] %v3458_v16 }
  0xfb   :  { %v408_v22 = vmax.f32 %v298_v21, 0.0  ;;  %v2772_v23 = vpop.f32.mrb[14].mxu0  ;;  %v3469_v18 = vpop.permute.xlu1 %863 }
  0xfc   :  { %v313_v25 = vadd.f32 %v2772_v23, %v3390_v45  ;;  %v307_v26 = vpop.f32.mrb[15].mxu0 }
  0xfd   :  { %v308_v27 = vadd.f32 %v3390_v45, %v307_v26  ;;  %2823 = vmatprep.mubr.msk.f32.mxu1 %vm74_vm0, %v408_v22  ;;  %v3471_v19 = vpop.permute.xlu0 %943 }
  0xfe   :  { %2824 = vmatmul.mubr.msk.f32.gmra.mrb[12].mxu1 %vm74_vm0, %v409_v24  ;;  %v411_v30 = vmax.f32 %v313_v25, 0.0  ;;  %4708 = vst [vmem:[#allocation6_spill] sm:$0xff] %v3471_v19 }
  0xff   :  { %v410_v28 = vmax.f32 %v308_v27, 0.0  ;;  %v2775_v29 = vpop.f32.mrb[16].mxu0  ;;  %v3473_v20 = vpop.permute.xlu1 %953 }
 0x100   :  { %v323_v31 = vadd.f32 %v2775_v29, %v3390_v45  ;;  %v317_v32 = vpop.f32.mrb[17].mxu0  ;;  %4709 = vst [vmem:[#allocation7_spill] sm:$0xff] %v3473_v20 }
 0x101   :  { %v318_v33 = vadd.f32 %v3390_v45, %v317_v32  ;;  %2826 = vmatprep.mubr.msk.f32.mxu1 %vm74_vm0, %v410_v28  ;;  %v3475_v21 = vpop.permute.xlu0 %948 }
 0x102   :  { %2827 = vmatmul.mubr.msk.f32.gmra.mrb[14].mxu1 %vm74_vm0, %v411_v30  ;;  %v413_v36 = vmax.f32 %v323_v31, 0.0  ;;  %4710 = vst [vmem:[#allocation8_spill] sm:$0xff] %v3475_v21 }
 0x103   :  { %v412_v34 = vmax.f32 %v318_v33, 0.0  ;;  %v2778_v35 = vpop.f32.mrb[18].mxu0  ;;  %v3477_v22 = vpop.permute.xlu1 %873 }
 0x104   :  { %v333_v37 = vadd.f32 %v2778_v35, %v3390_v45  ;;  %v327_v38 = vpop.f32.mrb[19].mxu0 }
 0x105   :  { %v328_v39 = vadd.f32 %v3390_v45, %v327_v38  ;;  %2829 = vmatprep.mubr.msk.f32.mxu1 %vm74_vm0, %v412_v34  ;;  %v3479_v23 = vpop.permute.xlu0 %868 }
 0x106   :  { %2830 = vmatmul.mubr.msk.f32.gmra.mrb[16].mxu1 %vm74_vm0, %v413_v36  ;;  %v415_v42 = vmax.f32 %v333_v37, 0.0  ;;  %v3508_v36 = vld [vmem:[%s4542_s7] ss:$0 sm:$0xff] }
 0x107   :  { %v414_v40 = vmax.f32 %v328_v39, 0.0  ;;  %v2781_v41 = vpop.f32.mrb[20].mxu0  ;;  %v3481_v24 = vpop.permute.xlu1 %963 }
 0x108   :  { %v343_v43 = vadd.f32 %v2781_v41, %v3390_v45  ;;  %v337_v44 = vpop.f32.mrb[21].mxu0  ;;  %4711 = vst [vmem:[#allocation9_spill] sm:$0xff] %v3481_v24 }
 0x109   :  { %v338_v46 = vadd.f32 %v3390_v45, %v337_v44  ;;  %2832 = vmatprep.mubr.msk.f32.mxu1 %vm74_vm0, %v414_v40  ;;  %v3483_v25 = vpop.permute.xlu0 %958 }
 0x10a   :  { %2833 = vmatmul.mubr.msk.f32.gmra.mrb[18].mxu1 %vm74_vm0, %v415_v42  ;;  %v417_v49 = vmax.f32 %v343_v43, 0.0  ;;  %4712 = vst [vmem:[#allocation10_spill] sm:$0xff] %v3483_v25 }
 0x10b   :  { %v416_v47 = vmax.f32 %v338_v46, 0.0  ;;  %v2784_v48 = vpop.f32.mrb[22].mxu0  ;;  %v3485_v26 = vpop.permute.xlu1 %883 }
 0x10c   :  { %v353_v50 = vadd.f32 %v2784_v48, %v3390_v45  ;;  %v347_v51 = vpop.f32.mrb[23].mxu0 }
 0x10d   :  { %v348_v52 = vadd.f32 %v3390_v45, %v347_v51  ;;  %2835 = vmatprep.mubr.msk.f32.mxu1 %vm74_vm0, %v416_v47  ;;  %v3487_v27 = vpop.permute.xlu0 %878 }
 0x10e   :  { %2836 = vmatmul.mubr.msk.f32.gmra.mrb[20].mxu1 %vm74_vm0, %v417_v49  ;;  %v419_v55 = vmax.f32 %v353_v50, 0.0 }
 0x10f   :  { %v418_v53 = vmax.f32 %v348_v52, 0.0  ;;  %v2787_v54 = vpop.f32.mrb[24].mxu0  ;;  %v3489_v28 = vpop.permute.xlu1 %973 }
 0x110   :  { %v363_v56 = vadd.f32 %v2787_v54, %v3390_v45  ;;  %v357_v57 = vpop.f32.mrb[25].mxu0  ;;  %4713 = vst [vmem:[#allocation11_spill] sm:$0xff] %v3489_v28 }
 0x111   :  { %v358_v58 = vadd.f32 %v3390_v45, %v357_v57  ;;  %2838 = vmatprep.mubr.msk.f32.mxu1 %vm74_vm0, %v418_v53  ;;  %v3491_v29 = vpop.permute.xlu0 %968 }
 0x112   :  { %2839 = vmatmul.mubr.msk.f32.gmra.mrb[22].mxu1 %vm74_vm0, %v419_v55  ;;  %v421_v61 = vmax.f32 %v363_v56, 0.0  ;;  %4714 = vst [vmem:[#allocation12_spill] sm:$0xff] %v3491_v29 }
 0x113   :  { %v420_v59 = vmax.f32 %v358_v58, 0.0  ;;  %v2790_v60 = vpop.f32.mrb[26].mxu0  ;;  %v3493_v30 = vpop.permute.xlu1 %893 }
 0x114   :  { %v373_v62 = vadd.f32 %v2790_v60, %v3390_v45  ;;  %v367_v63 = vpop.f32.mrb[27].mxu0 }
 0x115   :  { %v368_v0 = vadd.f32 %v3390_v45, %v367_v63  ;;  %2841 = vmatprep.mubr.msk.f32.mxu1 %vm74_vm0, %v420_v59  ;;  %v3495_v31 = vpop.permute.xlu0 %888 }
 0x116   :  { %2842 = vmatmul.mubr.msk.f32.gmra.mrb[24].mxu1 %vm74_vm0, %v421_v61  ;;  %v423_v3 = vmax.f32 %v373_v62, 0.0 }
 0x117   :  { %v422_v1 = vmax.f32 %v368_v0, 0.0  ;;  %v2793_v2 = vpop.f32.mrb[28].mxu0  ;;  %v3497_v32 = vpop.permute.xlu1 %983 }
 0x118   :  { %v383_v4 = vadd.f32 %v2793_v2, %v3390_v45  ;;  %v377_v5 = vpop.f32.mrb[29].mxu0  ;;  %4715 = vst [vmem:[#allocation13_spill] sm:$0xff] %v3497_v32 }
 0x119   :  { %v378_v6 = vadd.f32 %v3390_v45, %v377_v5  ;;  %2844 = vmatprep.mubr.msk.f32.mxu1 %vm74_vm0, %v422_v1  ;;  %v3499_v33 = vpop.permute.xlu0 %978 }
 0x11a   :  { %2845 = vmatmul.mubr.msk.f32.gmra.mrb[26].mxu1 %vm74_vm0, %v423_v3  ;;  %v425_v9 = vmax.f32 %v383_v4, 0.0  ;;  %4716 = vst [vmem:[#allocation14_spill] sm:$0xff] %v3499_v33 }
 0x11b   :  { %v424_v7 = vmax.f32 %v378_v6, 0.0  ;;  %v2796_v8 = vpop.f32.mrb[30].mxu0  ;;  %v3501_v34 = vpop.permute.xlu1 %903 }
 0x11c   :  { %v393_v10 = vadd.f32 %v2796_v8, %v3390_v45  ;;  %v387_v11 = vpop.f32.mrb[31].mxu0  ;;  %4717 = vst [vmem:[#allocation15_spill] sm:$0xff] %v3501_v34 }
 0x11d   :  { %v388_v12 = vadd.f32 %v3390_v45, %v387_v11  ;;  %2847 = vmatprep.mubr.msk.f32.mxu1 %vm74_vm0, %v424_v7  ;;  %v2896_v45 = vld [vmem:[%s4536_s1 + $0x84] ss:$8 sps:$4 sm:$0xff]   ;;  %v3503_v35 = vpop.permute.xlu0 %898 }
 0x11e   :  { %2848 = vmatmul.mubr.msk.f32.gmra.mrb[28].mxu1 %vm74_vm0, %v425_v9  ;;  %v427_v14 = vmax.f32 %v393_v10, 0.0  ;;  %4718 = vst [vmem:[#allocation16_spill] sm:$0xff] %v3503_v35 }
 0x11f   :  { %v426_v13 = vmax.f32 %v388_v12, 0.0  ;;  %v3510_v37 = vpop.permute.xlu1 %993 }
 0x120   :  { %4719 = vst [vmem:[#allocation17_spill] sm:$0xff] %v3510_v37 }
 0x121   :  { %2850 = vmatprep.mubr.msk.f32.mxu1 %vm74_vm0, %v426_v13  ;;  %v3512_v39 = vpop.permute.xlu0 %988 }
 0x122   :  { %2851 = vmatmul.mubr.msk.f32.gmra.mrb[30].mxu1 %vm74_vm0, %v427_v14  ;;  %4720 = vst [vmem:[#allocation18_spill] sm:$0xff] %v3512_v39 }
 0x123   :  { %1320 = vmatprep.mubr.bf16.mxu1 %v2896_v45  ;;  %v3527_v49 = vpop.permute.xlu1 %913 }
 0x124   :  { %4721 = vst [vmem:[#allocation19_spill] sm:$0xff] %v3527_v49 }
 0x125   :  { %v3534_v52 = vpop.permute.xlu0 %908 }
 0x126   :  { %4722 = vst [vmem:[#allocation20_spill] sm:$0xff] %v3534_v52 }
 0x127   :  { %v3550_v61 = vpop.permute.xlu1 %1003 }
 0x128   :  { %4723 = vst [vmem:[#allocation21_spill] sm:$0xff] %v3550_v61 }
 0x129   :  { %v3554_v0 = vpop.permute.xlu0 %998 }
 0x12a   :  { %4724 = vst [vmem:[#allocation22_spill] sm:$0xff] %v3554_v0 }
 0x12b   :  { %v3571_v10 = vpop.permute.xlu1 %923 }
 0x12c   :  { %4726 = vst [vmem:[#allocation24_spill] sm:$0xff] %v3571_v10 }
 0x12d   :  { %v3578_v13 = vpop.permute.xlu0 %918 }
 0x12e   :  { %4728 = vst [vmem:[#allocation26_spill] sm:$0xff] %v3578_v13 }
 0x1b9   :  { %v2807_v38 = vpop.f32.mrb[0].mxu1 }
 0x1ba   :  { %v3515_v40 = vadd.f32 %v2807_v38, %v3508_v36  ;;  %v601_v41 = vpop.f32.mrb[1].mxu1 }
 0x1bb   :  { %v3518_v42 = vadd.f32 %v3508_v36, %v601_v41 }
 0x1bc   :  { %v1017_v43 = vmul.f32 %v3469_v18, %v3515_v40 }
 0x1bd   :  { %v1016_v44 = vmul.f32 %v3456_v15, %v3518_v42  ;;  %v2810_v46 = vpop.f32.mrb[2].mxu1 }
 0x1be   :  { %v3525_v47 = vadd.f32 %v2810_v46, %v3508_v36  ;;  %v611_v48 = vpop.f32.mrb[3].mxu1 }
 0x1bf   :  { %v3529_v50 = vpack.c.bf16 %v1017_v43, %v1016_v44  ;;  %v3532_v51 = vadd.f32 %v3508_v36, %v611_v48 }
 0x1c0   :  { %v1019_v53 = vmul.f32 %v3477_v22, %v3525_v47 }
 0x1c1   :  { %v1018_v54 = vmul.f32 %v3479_v23, %v3532_v51  ;;  %v2813_v55 = vpop.f32.mrb[4].mxu1 }
 0x1c2   :  { %v3541_v56 = vadd.f32 %v2813_v55, %v3508_v36  ;;  %v621_v57 = vpop.f32.mrb[5].mxu1 }
 0x1c3   :  { %v3543_v58 = vpack.c.bf16 %v1019_v53, %v1018_v54  ;;  %v3546_v59 = vadd.f32 %v3508_v36, %v621_v57  ;;  %v3594_v53 = vpop.permute.xlu1 %1013  ;;  %v3598_v57 = vpop.permute.xlu0 %1008 }
 0x1c4   :  { %v1021_v60 = vmul.f32 %v3485_v26, %v3541_v56  ;;  %4731 = vst [vmem:[#allocation29_spill] sm:$0xff] %v3594_v53  ;;  %4732 = vst [vmem:[#allocation30_spill] sm:$0xff] %v3598_v57 }
 0x1c5   :  { %v1020_v62 = vmul.f32 %v3487_v27, %v3546_v59  ;;  %v2816_v63 = vpop.f32.mrb[6].mxu1 }
 0x1c6   :  { %v3557_v1 = vadd.f32 %v2816_v63, %v3508_v36  ;;  %v631_v2 = vpop.f32.mrb[7].mxu1 }
 0x1c7   :  { %v3559_v3 = vpack.c.bf16 %v1021_v60, %v1020_v62  ;;  %v3562_v4 = vadd.f32 %v3508_v36, %v631_v2 }
 0x1c8   :  { %v1023_v5 = vmul.f32 %v3493_v30, %v3557_v1 }
 0x1c9   :  { %v1022_v6 = vmul.f32 %v3495_v31, %v3562_v4  ;;  %v2819_v7 = vpop.f32.mrb[8].mxu1 }
 0x1ca   :  { %v3569_v8 = vadd.f32 %v2819_v7, %v3508_v36  ;;  %v641_v9 = vpop.f32.mrb[9].mxu1 }
 0x1cb   :  { %v3573_v11 = vpack.c.bf16 %v1023_v5, %v1022_v6  ;;  %v3576_v12 = vadd.f32 %v3508_v36, %v641_v9 }
 0x1cc   :  { %4725 = vst [vmem:[#allocation23_spill] sm:$0xff] %v3569_v8  ;;  %v1025_v14 = vmul.f32 %v3501_v34, %v3569_v8 }
 0x1cd   :  { %4727 = vst [vmem:[#allocation25_spill] sm:$0xff] %v3576_v12  ;;  %v1024_v45 = vmul.f32 %v3503_v35, %v3576_v12  ;;  %v2822_v38 = vpop.f32.mrb[10].mxu1  ;;  %v3945_v12 = vmul.f32 0.1, %v3518_v42 }
 0x1ce   :  { %v3585_v41 = vadd.f32 %v2822_v38, %v3508_v36  ;;  %v651_v43 = vpop.f32.mrb[11].mxu1 }
 0x1cf   :  { %v3587_v44 = vpack.c.bf16 %v1025_v14, %v1024_v45  ;;  %v3590_v46 = vadd.f32 %v3508_v36, %v651_v43  ;;  %v3615_v45 = vpop.permute.xlu1 %933  ;;  %4787 = vst [vmem:[#allocation85_spill] sm:$0xff] %v3945_v12 }
 0x1d0   :  { %4729 = vst [vmem:[#allocation27_spill] sm:$0xff] %v3585_v41  ;;  %v1027_v48 = vmul.f32 %v3527_v49, %v3585_v41  ;;  %4736 = vst [vmem:[#allocation34_spill] sm:$0xff] %v3615_v45 }
 0x1d1   :  { %4730 = vst [vmem:[#allocation28_spill] sm:$0xff] %v3590_v46  ;;  %v1026_v54 = vmul.f32 %v3534_v52, %v3590_v46  ;;  %v2825_v55 = vpop.f32.mrb[12].mxu1 }
 0x1d2   :  { %v3601_v60 = vadd.f32 %v2825_v55, %v3508_v36  ;;  %v661_v62 = vpop.f32.mrb[13].mxu1 }
 0x1d3   :  { %v3603_v63 = vpack.c.bf16 %v1027_v48, %v1026_v54  ;;  %v3606_v2 = vadd.f32 %v3508_v36, %v661_v62  ;;  %v3622_v48 = vpop.permute.xlu0 %928 }
 0x1d4   :  { %4733 = vst [vmem:[#allocation31_spill] sm:$0xff] %v3601_v60  ;;  %v1029_v5 = vmul.f32 %v3571_v10, %v3601_v60  ;;  %4738 = vst [vmem:[#allocation36_spill] sm:$0xff] %v3622_v48 }
 0x1d5   :  { %4734 = vst [vmem:[#allocation32_spill] sm:$0xff] %v3606_v2  ;;  %v1028_v6 = vmul.f32 %v3578_v13, %v3606_v2  ;;  %v2828_v7 = vpop.f32.mrb[14].mxu1 }
 0x1d6   :  { %v3613_v9 = vadd.f32 %v2828_v7, %v3508_v36  ;;  %v671_v14 = vpop.f32.mrb[15].mxu1 }
 0x1d7   :  { %v3617_v38 = vpack.c.bf16 %v1029_v5, %v1028_v6  ;;  %v3620_v43 = vadd.f32 %v3508_v36, %v671_v14 }
 0x1d8   :  { %4735 = vst [vmem:[#allocation33_spill] sm:$0xff] %v3613_v9  ;;  %v1031_v54 = vmul.f32 %v3615_v45, %v3613_v9 }
 0x1d9   :  { %4737 = vst [vmem:[#allocation35_spill] sm:$0xff] %v3620_v43  ;;  %v1030_v55 = vmul.f32 %v3622_v48, %v3620_v43  ;;  %v2831_v62 = vpop.f32.mrb[16].mxu1 }
 0x1da   :  { %v3629_v7 = vadd.f32 %v2831_v62, %v3508_v36  ;;  %v681_v13 = vpop.f32.mrb[17].mxu1 }
 0x1db   :  { %v3631_v10 = vpack.c.bf16 %v1031_v54, %v1030_v55  ;;  %v3634_v5 = vadd.f32 %v3508_v36, %v681_v13 }
 0x1dc   :  { %v1033_v6 = vmul.f32 %v3471_v19, %v3629_v7 }
 0x1dd   :  { %v1032_v14 = vmul.f32 %v3458_v16, %v3634_v5  ;;  %v2834_v45 = vpop.f32.mrb[18].mxu1 }
 0x1de   :  { %v3641_v9 = vadd.f32 %v2834_v45, %v3508_v36  ;;  %v691_v48 = vpop.f32.mrb[19].mxu1 }
 0x1df   :  { %v3644_v62 = vadd.f32 %v3508_v36, %v691_v48  ;;  %v1056_v43 = vpack.c.bf16 %v1033_v6, %v1032_v14 }
 0x1e0   :  { %v1035_v54 = vmul.f32 %v3473_v20, %v3641_v9 }
 0x1e1   :  { %v1034_v13 = vmul.f32 %v3475_v21, %v3644_v62  ;;  %v2837_v55 = vpop.f32.mrb[20].mxu1  ;;  %2405 = vmatprep.subr.bf16.mxu0 %v1056_v43  ;;  %2869 = vmatprep.subr.bf16.mxu1 %v1056_v43 }
 0x1e2   :  { %v3651_v60 = vadd.f32 %v2837_v55, %v3508_v36  ;;  %v701_v2 = vpop.f32.mrb[21].mxu1  ;;  %2406 = vmatpush3.bf16.msra.mxu0 %v3529_v50  ;;  %2877 = vmatpush3.bf16.msra.mxu1 %v3529_v50 }
 0x1e3   :  { %v3656_v45 = vadd.f32 %v3508_v36, %v701_v2  ;;  %v1057_v48 = vpack.c.bf16 %v1035_v54, %v1034_v13 }
 0x1e4   :  { %v1037_v6 = vmul.f32 %v3481_v24, %v3651_v60 }
 0x1e5   :  { %v1036_v14 = vmul.f32 %v3483_v25, %v3656_v45  ;;  %v2840_v52 = vpop.f32.mrb[22].mxu1  ;;  %2407 = vmatprep.subr.bf16.mxu0 %v1057_v48  ;;  %2870 = vmatprep.subr.bf16.mxu1 %v1057_v48 }
 0x1e6   :  { %v3663_v43 = vadd.f32 %v2840_v52, %v3508_v36  ;;  %v711_v55 = vpop.f32.mrb[23].mxu1  ;;  %2408 = vmatpush3.bf16.msra.mxu0 %v3543_v58  ;;  %2878 = vmatpush3.bf16.msra.mxu1 %v3543_v58 }
 0x1e7   :  { %v3668_v50 = vadd.f32 %v3508_v36, %v711_v55  ;;  %v1058_v2 = vpack.c.bf16 %v1037_v6, %v1036_v14 }
 0x1e8   :  { %v1039_v54 = vmul.f32 %v3489_v28, %v3663_v43 }
 0x1e9   :  { %v1038_v13 = vmul.f32 %v3491_v29, %v3668_v50  ;;  %v2843_v49 = vpop.f32.mrb[24].mxu1  ;;  %2409 = vmatprep.subr.bf16.mxu0 %v1058_v2  ;;  %2871 = vmatprep.subr.bf16.mxu1 %v1058_v2  ;;  %v3951_v29 = vmul.f32 0.1, %v3515_v40 }
 0x1ea   :  { %v3675_v52 = vadd.f32 %v2843_v49, %v3508_v36  ;;  %v721_v48 = vpop.f32.mrb[25].mxu1  ;;  %2410 = vmatpush3.bf16.msra.mxu0 %v3559_v3  ;;  %2879 = vmatpush3.bf16.msra.mxu1 %v3559_v3 }
 0x1eb   :  { %v3680_v58 = vadd.f32 %v3508_v36, %v721_v48  ;;  %v1059_v6 = vpack.c.bf16 %v1039_v54, %v1038_v13  ;;  %4789 = vst [vmem:[#allocation87_spill] sm:$0xff] %v3951_v29 }
 0x1ec   :  { %4739 = vst [vmem:[#allocation37_spill] sm:$0xff] %v3675_v52  ;;  %v1041_v14 = vmul.f32 %v3497_v32, %v3675_v52 }
 0x1ed   :  { %4740 = vst [vmem:[#allocation38_spill] sm:$0xff] %v3680_v58  ;;  %v1040_v55 = vmul.f32 %v3499_v33, %v3680_v58  ;;  %v2846_v41 = vpop.f32.mrb[26].mxu1  ;;  %2411 = vmatprep.subr.bf16.mxu0 %v1059_v6  ;;  %2872 = vmatprep.subr.bf16.mxu1 %v1059_v6 }
 0x1ee   :  { %v3687_v49 = vadd.f32 %v2846_v41, %v3508_v36  ;;  %v731_v2 = vpop.f32.mrb[27].mxu1  ;;  %2412 = vmatpush3.bf16.msra.mxu0 %v3573_v11  ;;  %2880 = vmatpush3.bf16.msra.mxu1 %v3573_v11 }
 0x1ef   :  { %v3692_v3 = vadd.f32 %v3508_v36, %v731_v2  ;;  %v1060_v54 = vpack.c.bf16 %v1041_v14, %v1040_v55 }
 0x1f0   :  { %4741 = vst [vmem:[#allocation39_spill] sm:$0xff] %v3687_v49  ;;  %v1043_v13 = vmul.f32 %v3510_v37, %v3687_v49 }
 0x1f1   :  { %4742 = vst [vmem:[#allocation40_spill] sm:$0xff] %v3692_v3  ;;  %v1042_v48 = vmul.f32 %v3512_v39, %v3692_v3  ;;  %v2849_v46 = vpop.f32.mrb[28].mxu1  ;;  %2413 = vmatprep.subr.bf16.mxu0 %v1060_v54  ;;  %2873 = vmatprep.subr.bf16.mxu1 %v1060_v54 }
 0x1f2   :  { %v3699_v41 = vadd.f32 %v2849_v46, %v3508_v36  ;;  %v741_v6 = vpop.f32.mrb[29].mxu1  ;;  %2414 = vmatpush3.bf16.msra.mxu0 %v3587_v44  ;;  %2881 = vmatpush3.bf16.msra.mxu1 %v3587_v44 }
 0x1f3   :  { %v3704_v11 = vadd.f32 %v3508_v36, %v741_v6  ;;  %v1061_v14 = vpack.c.bf16 %v1043_v13, %v1042_v48 }
 0x1f4   :  { %4743 = vst [vmem:[#allocation41_spill] sm:$0xff] %v3699_v41  ;;  %v1045_v55 = vmul.f32 %v3550_v61, %v3699_v41 }
 0x1f5   :  { %4744 = vst [vmem:[#allocation42_spill] sm:$0xff] %v3704_v11  ;;  %v1044_v2 = vmul.f32 %v3554_v0, %v3704_v11  ;;  %v2852_v39 = vpop.f32.mrb[30].mxu1  ;;  %2415 = vmatprep.subr.bf16.mxu0 %v1061_v14  ;;  %2874 = vmatprep.subr.bf16.mxu1 %v1061_v14  ;;  %v3744_v14 = vld [vmem:[%s4536_s1 + $0x94] ss:$8 sps:$4 sm:$0xff]  }
 0x1f6   :  { %v3711_v46 = vadd.f32 %v2852_v39, %v3508_v36  ;;  %v751_v54 = vpop.f32.mrb[31].mxu1  ;;  %2416 = vmatpush3.bf16.msra.mxu0 %v3603_v63  ;;  %2882 = vmatpush3.bf16.msra.mxu1 %v3603_v63  ;;  %v3732_v63 = vld [vmem:[%s4536_s1 + $0x80] ss:$8 sps:$4 sm:$0xff]   ;;  %4750 = vst [vmem:[#allocation48_spill] sm:$0xff] %v3744_v14 }
 0x1f7   :  { %v3716_v44 = vadd.f32 %v3508_v36, %v751_v54  ;;  %v1062_v13 = vpack.c.bf16 %v1045_v55, %v1044_v2  ;;  %v3727_v36 = vld [vmem:[%s4536_s1] ss:$8 sps:$4 sm:$0xff]   ;;  %4748 = vst [vmem:[#allocation46_spill] sm:$0xff] %v3732_v63  ;;  %v3758_v55 = vld [vmem:[%s4536_s1 + $0x90] ss:$8 sps:$4 sm:$0xff]  }
 0x1f8   :  { %4745 = vst [vmem:[#allocation43_spill] sm:$0xff] %v3711_v46  ;;  %v1047_v48 = vmul.f32 %v3594_v53, %v3711_v46  ;;  %4747 = vst [vmem:[#allocation45_spill] sm:$0xff] %v3727_v36  ;;  %v3763_v2 = vld [vmem:[%s4536_s1 + $0x24] ss:$8 sps:$4 sm:$0xff]  }
 0x1f9   :  { %4746 = vst [vmem:[#allocation44_spill] sm:$0xff] %v3716_v44  ;;  %v1046_v6 = vmul.f32 %v3598_v57, %v3716_v44  ;;  %2417 = vmatprep.subr.bf16.mxu0 %v1062_v13  ;;  %2875 = vmatprep.subr.bf16.mxu1 %v1062_v13  ;;  %4752 = vst [vmem:[#allocation50_spill] sm:$0xff] %v3758_v55  ;;  %v3768_v54 = vld [vmem:[%s4536_s1 + $0xa4] ss:$8 sps:$4 sm:$0xff]   ;;  %v3777_v13 = vld [vmem:[%s4536_s1 + $0x20] ss:$8 sps:$4 sm:$0xff]  }
 0x1fa   :  { %2418 = vmatpush3.bf16.msra.mxu0 %v3617_v38  ;;  %2883 = vmatpush3.bf16.msra.mxu1 %v3617_v38  ;;  %v3739_v38 = vld [vmem:[%s4536_s1 + $0x14] ss:$8 sps:$4 sm:$0xff]   ;;  %4753 = vst [vmem:[#allocation51_spill] sm:$0xff] %v3763_v2  ;;  %4754 = vst [vmem:[#allocation52_spill] sm:$0xff] %v3768_v54 }
 0x1fb   :  { %v1063_v39 = vpack.c.bf16 %v1047_v48, %v1046_v6  ;;  %4749 = vst [vmem:[#allocation47_spill] sm:$0xff] %v3739_v38  ;;  %4755 = vst [vmem:[#allocation53_spill] sm:$0xff] %v3777_v13  ;;  %v3782_v48 = vld [vmem:[%s4536_s1 + $0xa0] ss:$8 sps:$4 sm:$0xff]   ;;  %v3787_v6 = vld [vmem:[%s4536_s1 + $0x34] ss:$8 sps:$4 sm:$0xff]  }
 0x1fc   :  { %4756 = vst [vmem:[#allocation54_spill] sm:$0xff] %v3782_v48  ;;  %4757 = vst [vmem:[#allocation55_spill] sm:$0xff] %v3787_v6 }
 0x1fd   :  { %2419 = vmatprep.subr.bf16.mxu0 %v1063_v39  ;;  %2876 = vmatprep.subr.bf16.mxu1 %v1063_v39  ;;  %v3792_v39 = vld [vmem:[%s4536_s1 + $0xb4] ss:$8 sps:$4 sm:$0xff]  }
 0x1fe   :  { %2420 = vmatpush3.bf16.msra.mxu0 %v3631_v10  ;;  %2884 = vmatpush3.bf16.msra.mxu1 %v3631_v10  ;;  %v3753_v10 = vld [vmem:[%s4536_s1 + $0x10] ss:$8 sps:$4 sm:$0xff]   ;;  %4758 = vst [vmem:[#allocation56_spill] sm:$0xff] %v3792_v39 }
 0x1ff   :  { %4751 = vst [vmem:[#allocation49_spill] sm:$0xff] %v3753_v10 }
 0x201   :  { %1257 = vmatmul.mubr.bf16.vlgmr.msra.gmra.mrb[32].mxu0 %v3727_v36  ;;  %1321 = vmatmul.mubr.bf16.vlgmr.msra.gmra.mrb[32].mxu1 %v3732_v63  ;;  %v3830_v63 = vld [vmem:[%s4536_s1 + $0xc0] ss:$8 sps:$4 sm:$0xff]  }
 0x202   :  { %1264 = vmatprep.mubr.bf16.mxu0 %v3739_v38  ;;  %1328 = vmatprep.mubr.bf16.mxu1 %v3744_v14  ;;  %v3811_v14 = vld [vmem:[%s4536_s1 + $0x44] ss:$8 sps:$4 sm:$0xff]   ;;  %4764 = vst [vmem:[#allocation62_spill] sm:$0xff] %v3830_v63 }
 0x203   :  { %4761 = vst [vmem:[#allocation59_spill] sm:$0xff] %v3811_v14 }
 0x209   :  { %1265 = vmatmul.mubr.bf16.gmra.mrb[36].mxu0 %v3753_v10  ;;  %1329 = vmatmul.mubr.bf16.gmra.mrb[36].mxu1 %v3758_v55  ;;  %v3806_v55 = vld [vmem:[%s4536_s1 + $0xb0] ss:$8 sps:$4 sm:$0xff]  }
 0x20a   :  { %1272 = vmatprep.mubr.bf16.mxu0 %v3763_v2  ;;  %1336 = vmatprep.mubr.bf16.mxu1 %v3768_v54  ;;  %v3801_v54 = vld [vmem:[%s4536_s1 + $0x30] ss:$8 sps:$4 sm:$0xff]   ;;  %4760 = vst [vmem:[#allocation58_spill] sm:$0xff] %v3806_v55 }
 0x20b   :  { %4759 = vst [vmem:[#allocation57_spill] sm:$0xff] %v3801_v54 }
 0x211   :  { %1273 = vmatmul.mubr.bf16.gmra.mrb[40].mxu0 %v3777_v13  ;;  %1337 = vmatmul.mubr.bf16.gmra.mrb[40].mxu1 %v3782_v48  ;;  %v3816_v48 = vld [vmem:[%s4536_s1 + $0xc4] ss:$8 sps:$4 sm:$0xff]  }
 0x212   :  { %1280 = vmatprep.mubr.bf16.mxu0 %v3787_v6  ;;  %1344 = vmatprep.mubr.bf16.mxu1 %v3792_v39  ;;  %4762 = vst [vmem:[#allocation60_spill] sm:$0xff] %v3816_v48  ;;  %v3825_v39 = vld [vmem:[%s4536_s1 + $0x40] ss:$8 sps:$4 sm:$0xff]  }
 0x213   :  { %4763 = vst [vmem:[#allocation61_spill] sm:$0xff] %v3825_v39 }
 0x219   :  { %1281 = vmatmul.mubr.bf16.gmra.mrb[44].mxu0 %v3801_v54  ;;  %1345 = vmatmul.mubr.bf16.gmra.mrb[44].mxu1 %v3806_v55  ;;  %v3835_v54 = vld [vmem:[%s4536_s1 + $0x54] ss:$8 sps:$4 sm:$0xff]  }
 0x21a   :  { %1288 = vmatprep.mubr.bf16.mxu0 %v3811_v14  ;;  %1352 = vmatprep.mubr.bf16.mxu1 %v3816_v48  ;;  %4765 = vst [vmem:[#allocation63_spill] sm:$0xff] %v3835_v54  ;;  %v3840_v55 = vld [vmem:[%s4536_s1 + $0xd4] ss:$8 sps:$4 sm:$0xff]   ;;  %v3849_v48 = vld [vmem:[%s4536_s1 + $0x50] ss:$8 sps:$4 sm:$0xff]  }
 0x21b   :  { %4766 = vst [vmem:[#allocation64_spill] sm:$0xff] %v3840_v55  ;;  %4767 = vst [vmem:[#allocation65_spill] sm:$0xff] %v3849_v48  ;;  %v3854_v14 = vld [vmem:[%s4536_s1 + $0xd0] ss:$8 sps:$4 sm:$0xff]  }
 0x21c   :  { %4768 = vst [vmem:[#allocation66_spill] sm:$0xff] %v3854_v14 }
 0x221   :  { %1289 = vmatmul.mubr.bf16.gmra.mrb[48].mxu0 %v3825_v39  ;;  %1353 = vmatmul.mubr.bf16.gmra.mrb[48].mxu1 %v3830_v63  ;;  %v3859_v39 = vld [vmem:[%s4536_s1 + $0x64] ss:$8 sps:$4 sm:$0xff]  }
 0x222   :  { %1296 = vmatprep.mubr.bf16.mxu0 %v3835_v54  ;;  %1360 = vmatprep.mubr.bf16.mxu1 %v3840_v55  ;;  %4769 = vst [vmem:[#allocation67_spill] sm:$0xff] %v3859_v39  ;;  %v3864_v63 = vld [vmem:[%s4536_s1 + $0xe4] ss:$8 sps:$4 sm:$0xff]   ;;  %v3873_v55 = vld [vmem:[%s4536_s1 + $0x60] ss:$8 sps:$4 sm:$0xff]  }
 0x223   :  { %4770 = vst [vmem:[#allocation68_spill] sm:$0xff] %v3864_v63  ;;  %4771 = vst [vmem:[#allocation69_spill] sm:$0xff] %v3873_v55  ;;  %v3878_v54 = vld [vmem:[%s4536_s1 + $0xe0] ss:$8 sps:$4 sm:$0xff]  }
 0x224   :  { %4772 = vst [vmem:[#allocation70_spill] sm:$0xff] %v3878_v54 }
 0x229   :  { %1297 = vmatmul.mubr.bf16.gmra.mrb[52].mxu0 %v3849_v48  ;;  %1361 = vmatmul.mubr.bf16.gmra.mrb[52].mxu1 %v3854_v14  ;;  %v3883_v48 = vld [vmem:[%s4536_s1 + $0x74] ss:$8 sps:$4 sm:$0xff]  }
 0x22a   :  { %1304 = vmatprep.mubr.bf16.mxu0 %v3859_v39  ;;  %1368 = vmatprep.mubr.bf16.mxu1 %v3864_v63  ;;  %4773 = vst [vmem:[#allocation71_spill] sm:$0xff] %v3883_v48  ;;  %v3888_v14 = vld [vmem:[%s4536_s1 + $0xf4] ss:$8 sps:$4 sm:$0xff]   ;;  %v3897_v63 = vld [vmem:[%s4536_s1 + $0x70] ss:$8 sps:$4 sm:$0xff]  }
 0x22b   :  { %4774 = vst [vmem:[#allocation72_spill] sm:$0xff] %v3888_v14  ;;  %4775 = vst [vmem:[#allocation73_spill] sm:$0xff] %v3897_v63  ;;  %v3902_v39 = vld [vmem:[%s4536_s1 + $0xf0] ss:$8 sps:$4 sm:$0xff]  }
 0x22c   :  { %4776 = vst [vmem:[#allocation74_spill] sm:$0xff] %v3902_v39 }
 0x231   :  { %1305 = vmatmul.mubr.bf16.gmra.mrb[56].mxu0 %v3873_v55  ;;  %1369 = vmatmul.mubr.bf16.gmra.mrb[56].mxu1 %v3878_v54  ;;  %v3908_v54 = vpop.permute.xlu0 %1467 }
 0x232   :  { %1312 = vmatprep.mubr.bf16.mxu0 %v3883_v48  ;;  %1376 = vmatprep.mubr.bf16.mxu1 %v3888_v14  ;;  %4777 = vst [vmem:[#allocation75_spill] sm:$0xff] %v3908_v54  ;;  %v3910_v14 = vpop.permute.xlu1 %1472 }
 0x233   :  { %4778 = vst [vmem:[#allocation76_spill] sm:$0xff] %v3910_v14 }
 0x235   :  { %v3912_v48 = vpop.permute.xlu0 %1387 }
 0x236   :  { %v3914_v55 = vpop.permute.xlu1 %1392 }
 0x237   :  { %4779 = vst [vmem:[#allocation77_spill] sm:$0xff] %v3914_v55 }
 0x239   :  { %1313 = vmatmul.mubr.bf16.gmra.mrb[60].mxu0 %v3897_v63  ;;  %1377 = vmatmul.mubr.bf16.gmra.mrb[60].mxu1 %v3902_v39  ;;  %v3916_v6 = vpop.permute.xlu0 %1477 }
 0x23a   :  { %1721 = vmatprep.mubr.bf16.mxu1 %v3463_v17  ;;  %1994 = vmatprep.mubr.bf16.mxu0 %v3463_v17  ;;  %4780 = vst [vmem:[#allocation78_spill] sm:$0xff] %v3916_v6  ;;  %v3918_v13 = vpop.permute.xlu1 %1482 }
 0x23b   :  { %4781 = vst [vmem:[#allocation79_spill] sm:$0xff] %v3918_v13 }
 0x23d   :  { %v3920_v2 = vpop.permute.xlu0 %1397 }
 0x23e   :  { %v3922_v63 = vpop.permute.xlu1 %1402 }
 0x241   :  { %v3924_v39 = vpop.permute.xlu0 %1487 }
 0x242   :  { %4782 = vst [vmem:[#allocation80_spill] sm:$0xff] %v3924_v39  ;;  %v3926_v10 = vpop.permute.xlu1 %1492 }
 0x243   :  { %4783 = vst [vmem:[#allocation81_spill] sm:$0xff] %v3926_v10 }
 0x245   :  { %v3928_v17 = vpop.permute.xlu0 %1407 }
 0x246   :  { %v3930_v38 = vpop.permute.xlu1 %1412 }
 0x249   :  { %v3932_v36 = vpop.permute.xlu0 %1497 }
 0x24a   :  { %4784 = vst [vmem:[#allocation82_spill] sm:$0xff] %v3932_v36  ;;  %v3934_v53 = vpop.permute.xlu1 %1502 }
 0x24b   :  { %4785 = vst [vmem:[#allocation83_spill] sm:$0xff] %v3934_v53 }
 0x24d   :  { %v3936_v57 = vpop.permute.xlu0 %1417 }
 0x24e   :  { %v3938_v46 = vpop.permute.xlu1 %1422 }
 0x251   :  { %v3940_v0 = vpop.permute.xlu0 %1507 }
 0x252   :  { %4786 = vst [vmem:[#allocation84_spill] sm:$0xff] %v3940_v0  ;;  %v3948_v0 = vmul.f32 0.1, %v3634_v5 }
 0x254   :  { %4788 = vst [vmem:[#allocation86_spill] sm:$0xff] %v3948_v0 }
 0x2d4   :  { %v2421_v44 = vpop.f32.mrb[32].mxu0  ;;  %v2469_v61 = vpop.f32.mrb[32].mxu1 }
 0x2d5   :  { %v2422_v41 = vpop.f32.mrb[33].mxu0  ;;  %v2470_v11 = vpop.f32.mrb[33].mxu1 }
 0x2d6   :  { %v2423_v37 = vadd.f32 %v2422_v41, %v2421_v44  ;;  %v2471_v49 = vadd.f32 %v2470_v11, %v2469_v61  ;;  %v2424_v3 = vpop.f32.mrb[34].mxu0  ;;  %v2472_v33 = vpop.f32.mrb[34].mxu1  ;;  %v3954_v61 = vmul.f32 0.1, %v3629_v7 }
 0x2d7   :  { %v2425_v35 = vpop.f32.mrb[35].mxu0  ;;  %v2473_v32 = vpop.f32.mrb[35].mxu1 }
 0x2d8   :  { %v1545_v34 = vmul.f32 %v2423_v37, %v3912_v48  ;;  %v1561_v52 = vmul.f32 %v2471_v49, %v3908_v54  ;;  %v2426_v8 = vadd.f32 %v2425_v35, %v2424_v3  ;;  %v2474_v58 = vadd.f32 %v2473_v32, %v2472_v33  ;;  %4790 = vst [vmem:[#allocation88_spill] sm:$0xff] %v3954_v61  ;;  %v3958_v11 = vpop.permute.xlu1 %1512  ;;  %v3960_v35 = vpop.permute.xlu0 %1427 }
 0x2d9   :  { %4791 = vst [vmem:[#allocation89_spill] sm:$0xff] %v3958_v11 }
 0x2da   :  { %v1546_v41 = vmul.f32 %v2426_v8, %v3914_v55  ;;  %v1562_v37 = vmul.f32 %v2474_v58, %v3910_v14  ;;  %v1609_v32 = vadd.f32 %v3945_v12, %v1545_v34  ;;  %v1625_v33 = vadd.f32 %v3948_v0, %v1561_v52 }
 0x2dc   :  { %v1610_v42 = vadd.f32 %v3951_v29, %v1546_v41  ;;  %v1626_v40 = vadd.f32 %v3954_v61, %v1562_v37  ;;  %v2427_v5 = vpop.f32.mrb[36].mxu0  ;;  %v2475_v49 = vpop.f32.mrb[36].mxu1  ;;  %v1641_v34 = vmul.f32 %v1609_v32, %v3456_v15  ;;  %v1657_v41 = vmul.f32 %v1625_v33, %v3458_v16 }
 0x2dd   :  { %v2428_v7 = vpop.f32.mrb[37].mxu0  ;;  %v2476_v3 = vpop.f32.mrb[37].mxu1  ;;  %v3979_v32 = vmul.f32 0.1, %v3525_v47 }
 0x2de   :  { %v1642_v8 = vmul.f32 %v1610_v42, %v3469_v18  ;;  %v2429_v44 = vadd.f32 %v2428_v7, %v2427_v5  ;;  %v2477_v58 = vadd.f32 %v2476_v3, %v2475_v49  ;;  %v2430_v14 = vpop.f32.mrb[38].mxu0  ;;  %v2478_v54 = vpop.f32.mrb[38].mxu1  ;;  %v1658_v55 = vmul.f32 %v1626_v40, %v3471_v19  ;;  %v4830_v19 = vld [vmem:[#allocation32_spill] sm:$0xff] }
 0x2df   :  { %v2431_v12 = vpop.f32.mrb[39].mxu0  ;;  %v2479_v52 = vpop.f32.mrb[39].mxu1  ;;  %v3973_v42 = vmul.f32 0.1, %v3532_v51  ;;  %v3976_v5 = vmul.f32 0.1, %v3644_v62 }
 0x2e0   :  { %v1547_v37 = vmul.f32 %v2429_v44, %v3920_v2  ;;  %v1563_v61 = vmul.f32 %v2477_v58, %v3916_v6  ;;  %v2432_v0 = vadd.f32 %v2431_v12, %v2430_v14  ;;  %v2480_v29 = vadd.f32 %v2479_v52, %v2478_v54  ;;  %v3986_v12 = vpop.permute.xlu1 %1432  ;;  %v3988_v14 = vpop.permute.xlu0 %1517 }
 0x2e1   :  { %4792 = vst [vmem:[#allocation90_spill] sm:$0xff] %v3976_v5  ;;  %v1681_v49 = vpack.c.bf16 %v1658_v55, %v1657_v41  ;;  %v1673_v40 = vpack.c.bf16 %v1642_v8, %v1641_v34  ;;  %v3982_v7 = vmul.f32 0.1, %v3641_v9  ;;  %4794 = vst [vmem:[#allocation92_spill] sm:$0xff] %v3988_v14 }
 0x2e2   :  { %v1548_v33 = vmul.f32 %v2432_v0, %v3922_v63  ;;  %v1564_v3 = vmul.f32 %v2480_v29, %v3918_v13  ;;  %v1611_v51 = vadd.f32 %v3973_v42, %v1547_v37  ;;  %v1627_v62 = vadd.f32 %v3976_v5, %v1563_v61 }
 0x2e3   :  { %4793 = vst [vmem:[#allocation91_spill] sm:$0xff] %v3982_v7  ;;  %2517 = vmatprep.subr.bf16.mxu1 %v1681_v49 }
 0x2e4   :  { %v1612_v55 = vadd.f32 %v3979_v32, %v1548_v33  ;;  %v1628_v47 = vadd.f32 %v3982_v7, %v1564_v3  ;;  %2518 = vmatpush3.bf16.msra.mxu1 %v1673_v40  ;;  %v2433_v9 = vpop.f32.mrb[40].mxu0  ;;  %v2481_v54 = vpop.f32.mrb[40].mxu1  ;;  %v1643_v61 = vmul.f32 %v1611_v51, %v3479_v23  ;;  %v1659_v33 = vmul.f32 %v1627_v62, %v3475_v21 }
 0x2e5   :  { %v2434_v8 = vpop.f32.mrb[41].mxu0  ;;  %v2482_v0 = vpop.f32.mrb[41].mxu1  ;;  %v4007_v51 = vmul.f32 0.1, %v3541_v56 }
 0x2e6   :  { %v1644_v29 = vmul.f32 %v1612_v55, %v3477_v22  ;;  %v2435_v44 = vadd.f32 %v2434_v8, %v2433_v9  ;;  %v2483_v58 = vadd.f32 %v2482_v0, %v2481_v54  ;;  %v2436_v34 = vpop.f32.mrb[42].mxu0  ;;  %v2484_v52 = vpop.f32.mrb[42].mxu1  ;;  %v1660_v41 = vmul.f32 %v1628_v47, %v3473_v20  ;;  %v4817_v20 = vld [vmem:[#allocation28_spill] sm:$0xff] }
 0x2e7   :  { %v2437_v37 = vpop.f32.mrb[43].mxu0  ;;  %v2485_v49 = vpop.f32.mrb[43].mxu1  ;;  %v4001_v55 = vmul.f32 0.1, %v3546_v59  ;;  %v4004_v9 = vmul.f32 0.1, %v3656_v45 }
 0x2e8   :  { %v1549_v40 = vmul.f32 %v2435_v44, %v3928_v17  ;;  %v1565_v3 = vmul.f32 %v2483_v58, %v3924_v39  ;;  %v2438_v7 = vadd.f32 %v2437_v37, %v2436_v34  ;;  %v2486_v13 = vadd.f32 %v2485_v49, %v2484_v52  ;;  %v4014_v44 = vpop.permute.xlu1 %1522  ;;  %v4016_v58 = vpop.permute.xlu0 %1437 }
 0x2e9   :  { %4795 = vst [vmem:[#allocation93_spill] sm:$0xff] %v4004_v9  ;;  %v1682_v54 = vpack.c.bf16 %v1660_v41, %v1659_v33  ;;  %v1674_v47 = vpack.c.bf16 %v1644_v29, %v1643_v61  ;;  %v4010_v8 = vmul.f32 0.1, %v3651_v60  ;;  %4797 = vst [vmem:[#allocation95_spill] sm:$0xff] %v4014_v44 }
 0x2ea   :  { %v1550_v62 = vmul.f32 %v2438_v7, %v3930_v38  ;;  %v1566_v0 = vmul.f32 %v2486_v13, %v3926_v10  ;;  %4798 = vst [vmem:[#allocation96_spill] sm:$0xff] %v4016_v58  ;;  %v1613_v59 = vadd.f32 %v4001_v55, %v1549_v40  ;;  %v1629_v45 = vadd.f32 %v4004_v9, %v1565_v3 }
 0x2eb   :  { %4796 = vst [vmem:[#allocation94_spill] sm:$0xff] %v4010_v8  ;;  %2519 = vmatprep.subr.bf16.mxu1 %v1682_v54 }
 0x2ec   :  { %v1614_v29 = vadd.f32 %v4007_v51, %v1550_v62  ;;  %v1630_v56 = vadd.f32 %v4010_v8, %v1566_v0  ;;  %2520 = vmatpush3.bf16.msra.mxu1 %v1674_v47  ;;  %v2439_v60 = vpop.f32.mrb[44].mxu0  ;;  %v2487_v34 = vpop.f32.mrb[44].mxu1  ;;  %v1645_v40 = vmul.f32 %v1613_v59, %v3487_v27  ;;  %v1661_v62 = vmul.f32 %v1629_v45, %v3483_v25 }
 0x2ed   :  { %v2440_v52 = vpop.f32.mrb[45].mxu0  ;;  %v2488_v7 = vpop.f32.mrb[45].mxu1  ;;  %v4035_v59 = vmul.f32 0.1, %v3557_v1 }
 0x2ee   :  { %v1646_v13 = vmul.f32 %v1614_v29, %v3485_v26  ;;  %v2441_v41 = vadd.f32 %v2440_v52, %v2439_v60  ;;  %v2489_v61 = vadd.f32 %v2488_v7, %v2487_v34  ;;  %v2442_v37 = vpop.f32.mrb[46].mxu0  ;;  %v2490_v49 = vpop.f32.mrb[46].mxu1  ;;  %v1662_v33 = vmul.f32 %v1630_v56, %v3481_v24  ;;  %v4805_v24 = vld [vmem:[#allocation25_spill] sm:$0xff] }
 0x2ef   :  { %v2443_v3 = vpop.f32.mrb[47].mxu0  ;;  %v2491_v54 = vpop.f32.mrb[47].mxu1  ;;  %v4029_v29 = vmul.f32 0.1, %v3562_v4  ;;  %v4032_v60 = vmul.f32 0.1, %v3668_v50 }
 0x2f0   :  { %v1551_v47 = vmul.f32 %v2441_v41, %v3936_v57  ;;  %v1567_v0 = vmul.f32 %v2489_v61, %v3932_v36  ;;  %v2444_v8 = vadd.f32 %v2443_v3, %v2442_v37  ;;  %v2492_v10 = vadd.f32 %v2491_v54, %v2490_v49  ;;  %v4042_v41 = vpop.permute.xlu1 %1442  ;;  %v4044_v61 = vpop.permute.xlu0 %1527 }
 0x2f1   :  { %4799 = vst [vmem:[#allocation97_spill] sm:$0xff] %v4032_v60  ;;  %v1683_v34 = vpack.c.bf16 %v1662_v33, %v1661_v62  ;;  %v1675_v56 = vpack.c.bf16 %v1646_v13, %v1645_v40  ;;  %v4038_v52 = vmul.f32 0.1, %v3663_v43  ;;  %4801 = vst [vmem:[#allocation99_spill] sm:$0xff] %v4042_v41 }
 0x2f2   :  { %v1552_v45 = vmul.f32 %v2444_v8, %v3938_v46  ;;  %v1568_v7 = vmul.f32 %v2492_v10, %v3934_v53  ;;  %4802 = vst [vmem:[#allocation100_spill] sm:$0xff] %v4044_v61  ;;  %v1615_v4 = vadd.f32 %v4029_v29, %v1551_v47  ;;  %v1631_v50 = vadd.f32 %v4032_v60, %v1567_v0 }
 0x2f3   :  { %4800 = vst [vmem:[#allocation98_spill] sm:$0xff] %v4038_v52  ;;  %2521 = vmatprep.subr.bf16.mxu1 %v1683_v34 }
 0x2f4   :  { %v1616_v13 = vadd.f32 %v4035_v59, %v1552_v45  ;;  %v1632_v1 = vadd.f32 %v4038_v52, %v1568_v7  ;;  %2522 = vmatpush3.bf16.msra.mxu1 %v1675_v56  ;;  %v2445_v43 = vpop.f32.mrb[48].mxu0  ;;  %v2493_v37 = vpop.f32.mrb[48].mxu1  ;;  %v1647_v47 = vmul.f32 %v1615_v4, %v3495_v31  ;;  %v4803_v45 = vld [vmem:[#allocation12_spill] sm:$0xff] }
 0x2f5   :  { %v2446_v49 = vpop.f32.mrb[49].mxu0  ;;  %v2494_v8 = vpop.f32.mrb[49].mxu1  ;;  %v1663_v53 = vmul.f32 %v1631_v50, %v4803_v45  ;;  %v4804_v7 = vld [vmem:[#allocation84_spill] sm:$0xff] }
 0x2f6   :  { %v1648_v10 = vmul.f32 %v1616_v13, %v3493_v30  ;;  %v2447_v33 = vadd.f32 %v2446_v49, %v2445_v43  ;;  %v2495_v40 = vadd.f32 %v2494_v8, %v2493_v37  ;;  %v2448_v3 = vpop.f32.mrb[50].mxu0  ;;  %v2496_v54 = vpop.f32.mrb[50].mxu1  ;;  %v1664_v62 = vmul.f32 %v1632_v1, %v3489_v28  ;;  %v4806_v43 = vld [vmem:[#allocation38_spill] sm:$0xff]  ;;  %v4808_v8 = vld [vmem:[#allocation23_spill] sm:$0xff]  ;;  %v4809_v28 = vld [vmem:[#allocation37_spill] sm:$0xff] }
 0x2f7   :  { %v2449_v0 = vpop.f32.mrb[51].mxu0  ;;  %v2497_v34 = vpop.f32.mrb[51].mxu1  ;;  %v4057_v13 = vmul.f32 0.1, %v4805_v24  ;;  %v4060_v37 = vmul.f32 0.1, %v4806_v43 }
 0x2f8   :  { %v1553_v56 = vmul.f32 %v2447_v33, %v3960_v35  ;;  %v1569_v52 = vmul.f32 %v2495_v40, %v4804_v7  ;;  %v2450_v60 = vadd.f32 %v2449_v0, %v2448_v3  ;;  %v2498_v36 = vadd.f32 %v2497_v34, %v2496_v54  ;;  %v4070_v40 = vpop.permute.xlu1 %1532  ;;  %v4072_v3 = vpop.permute.xlu0 %1447  ;;  %v4813_v0 = vld [vmem:[#allocation15_spill] sm:$0xff]  ;;  %v4814_v7 = vld [vmem:[#allocation13_spill] sm:$0xff]  ;;  %v4815_v45 = vld [vmem:[#allocation16_spill] sm:$0xff] }
 0x2f9   :  { %4807 = vst [vmem:[#allocation25_spill] sm:$0xff] %v4060_v37  ;;  %v1684_v49 = vpack.c.bf16 %v1664_v62, %v1663_v53  ;;  %v1676_v1 = vpack.c.bf16 %v1648_v10, %v1647_v47  ;;  %v4063_v4 = vmul.f32 0.1, %v4808_v8  ;;  %v4066_v25 = vmul.f32 0.1, %v4809_v28  ;;  %4811 = vst [vmem:[#allocation23_spill] sm:$0xff] %v4070_v40 }
 0x2fa   :  { %v1554_v50 = vmul.f32 %v2450_v60, %v3986_v12  ;;  %v1570_v33 = vmul.f32 %v2498_v36, %v3958_v11  ;;  %4812 = vst [vmem:[#allocation37_spill] sm:$0xff] %v4072_v3  ;;  %v1617_v24 = vadd.f32 %v4057_v13, %v1553_v56  ;;  %v1633_v54 = vadd.f32 %v4060_v37, %v1569_v52 }
 0x2fb   :  { %4810 = vst [vmem:[#allocation38_spill] sm:$0xff] %v4066_v25  ;;  %2523 = vmatprep.subr.bf16.mxu1 %v1684_v49 }
 0x2fc   :  { %v1618_v53 = vadd.f32 %v4063_v4, %v1554_v50  ;;  %v1634_v10 = vadd.f32 %v4066_v25, %v1570_v33  ;;  %2524 = vmatpush3.bf16.msra.mxu1 %v1676_v1  ;;  %v2451_v28 = vpop.f32.mrb[52].mxu0  ;;  %v2499_v62 = vpop.f32.mrb[52].mxu1  ;;  %v1649_v52 = vmul.f32 %v1617_v24, %v4815_v45  ;;  %v4816_v50 = vld [vmem:[#allocation14_spill] sm:$0xff] }
 0x2fd   :  { %v2452_v47 = vpop.f32.mrb[53].mxu0  ;;  %v2500_v60 = vpop.f32.mrb[53].mxu1  ;;  %v1665_v9 = vmul.f32 %v1633_v54, %v4816_v50  ;;  %v4828_v50 = vld [vmem:[#allocation20_spill] sm:$0xff] }
 0x2fe   :  { %v1650_v36 = vmul.f32 %v1618_v53, %v4813_v0  ;;  %v2453_v34 = vadd.f32 %v2452_v47, %v2451_v28  ;;  %v2501_v43 = vadd.f32 %v2500_v60, %v2499_v62  ;;  %v2454_v8 = vpop.f32.mrb[54].mxu0  ;;  %v2502_v11 = vpop.f32.mrb[54].mxu1  ;;  %v1666_v56 = vmul.f32 %v1634_v10, %v4814_v7  ;;  %v4819_v28 = vld [vmem:[#allocation40_spill] sm:$0xff]  ;;  %v4821_v60 = vld [vmem:[#allocation27_spill] sm:$0xff] }
 0x2ff   :  { %v2455_v49 = vpop.f32.mrb[55].mxu0  ;;  %v2503_v37 = vpop.f32.mrb[55].mxu1  ;;  %v4085_v53 = vmul.f32 0.1, %v4817_v20  ;;  %v4088_v62 = vmul.f32 0.1, %v4819_v28 }
 0x300   :  { %v1555_v1 = vmul.f32 %v2453_v34, %v4016_v58  ;;  %v1571_v33 = vmul.f32 %v2501_v43, %v3988_v14  ;;  %v2456_v25 = vadd.f32 %v2455_v49, %v2454_v8  ;;  %v2504_v39 = vadd.f32 %v2503_v37, %v2502_v11  ;;  %v4823_v7 = vld [vmem:[#allocation39_spill] sm:$0xff]  ;;  %v4098_v43 = vpop.permute.xlu1 %1452  ;;  %v4100_v11 = vpop.permute.xlu0 %1537  ;;  %v4827_v14 = vld [vmem:[#allocation17_spill] sm:$0xff] }
 0x301   :  { %4818 = vst [vmem:[#allocation15_spill] sm:$0xff] %v4085_v53  ;;  %4820 = vst [vmem:[#allocation16_spill] sm:$0xff] %v4088_v62  ;;  %v1685_v47 = vpack.c.bf16 %v1666_v56, %v1665_v9  ;;  %v1677_v10 = vpack.c.bf16 %v1650_v36, %v1649_v52  ;;  %v4091_v24 = vmul.f32 0.1, %v4821_v60  ;;  %v4094_v21 = vmul.f32 0.1, %v4823_v7 }
 0x302   :  { %v1556_v54 = vmul.f32 %v2456_v25, %v4042_v41  ;;  %v1572_v34 = vmul.f32 %v2504_v39, %v4014_v44  ;;  %4825 = vst [vmem:[#allocation27_spill] sm:$0xff] %v4098_v43  ;;  %v1619_v20 = vadd.f32 %v4085_v53, %v1555_v1  ;;  %v1635_v37 = vadd.f32 %v4088_v62, %v1571_v33  ;;  %v4826_v52 = vld [vmem:[#allocation19_spill] sm:$0xff] }
 0x303   :  { %4822 = vst [vmem:[#allocation28_spill] sm:$0xff] %v4091_v24  ;;  %4824 = vst [vmem:[#allocation40_spill] sm:$0xff] %v4094_v21  ;;  %2525 = vmatprep.subr.bf16.mxu1 %v1685_v47 }
 0x304   :  { %v1620_v9 = vadd.f32 %v4091_v24, %v1556_v54  ;;  %v1636_v36 = vadd.f32 %v4094_v21, %v1572_v34  ;;  %2526 = vmatpush3.bf16.msra.mxu1 %v1677_v10  ;;  %v2457_v7 = vpop.f32.mrb[56].mxu0  ;;  %v2505_v8 = vpop.f32.mrb[56].mxu1  ;;  %v1651_v33 = vmul.f32 %v1619_v20, %v4828_v50  ;;  %v4829_v54 = vld [vmem:[#allocation18_spill] sm:$0xff] }
 0x305   :  { %v2458_v56 = vpop.f32.mrb[57].mxu0  ;;  %v2506_v25 = vpop.f32.mrb[57].mxu1  ;;  %v1667_v5 = vmul.f32 %v1635_v37, %v4829_v54  ;;  %v4841_v54 = vld [vmem:[#allocation35_spill] sm:$0xff] }
 0x306   :  { %v1652_v39 = vmul.f32 %v1620_v9, %v4826_v52  ;;  %v2459_v49 = vadd.f32 %v2458_v56, %v2457_v7  ;;  %v2507_v28 = vadd.f32 %v2506_v25, %v2505_v8  ;;  %v2460_v60 = vpop.f32.mrb[58].mxu0  ;;  %v2508_v44 = vpop.f32.mrb[58].mxu1  ;;  %v1668_v1 = vmul.f32 %v1636_v36, %v4827_v14  ;;  %v4832_v7 = vld [vmem:[#allocation42_spill] sm:$0xff]  ;;  %v4834_v25 = vld [vmem:[#allocation31_spill] sm:$0xff]  ;;  %v4836_v14 = vld [vmem:[#allocation41_spill] sm:$0xff] }
 0x307   :  { %v2461_v47 = vpop.f32.mrb[59].mxu0  ;;  %v2509_v62 = vpop.f32.mrb[59].mxu1  ;;  %v4113_v9 = vmul.f32 0.1, %v4830_v19  ;;  %v4116_v8 = vmul.f32 0.1, %v4832_v7 }
 0x308   :  { %v1557_v10 = vmul.f32 %v2459_v49, %v4072_v3  ;;  %v1573_v34 = vmul.f32 %v2507_v28, %v4044_v61  ;;  %v2462_v21 = vadd.f32 %v2461_v47, %v2460_v60  ;;  %v2510_v6 = vadd.f32 %v2509_v62, %v2508_v44  ;;  %v4126_v28 = vpop.permute.xlu1 %1542  ;;  %v4128_v44 = vpop.permute.xlu0 %1457  ;;  %v4840_v61 = vld [vmem:[#allocation21_spill] sm:$0xff] }
 0x309   :  { %4831 = vst [vmem:[#allocation39_spill] sm:$0xff] %v4113_v9  ;;  %4833 = vst [vmem:[#allocation19_spill] sm:$0xff] %v4116_v8  ;;  %v1686_v56 = vpack.c.bf16 %v1668_v1, %v1667_v5  ;;  %v1678_v36 = vpack.c.bf16 %v1652_v39, %v1651_v33  ;;  %v4119_v20 = vmul.f32 0.1, %v4834_v25  ;;  %v4122_v16 = vmul.f32 0.1, %v4836_v14 }
 0x30a   :  { %v1558_v37 = vmul.f32 %v2462_v21, %v4098_v43  ;;  %v1574_v49 = vmul.f32 %v2510_v6, %v4070_v40  ;;  %4838 = vst [vmem:[#allocation42_spill] sm:$0xff] %v4128_v44  ;;  %v1621_v19 = vadd.f32 %v4113_v9, %v1557_v10  ;;  %v1637_v62 = vadd.f32 %v4116_v8, %v1573_v34  ;;  %v4839_v33 = vld [vmem:[#allocation24_spill] sm:$0xff] }
 0x30b   :  { %4835 = vst [vmem:[#allocation20_spill] sm:$0xff] %v4119_v20  ;;  %4837 = vst [vmem:[#allocation32_spill] sm:$0xff] %v4122_v16  ;;  %2527 = vmatprep.subr.bf16.mxu1 %v1686_v56  ;;  %v4137_v34 = vmul.f32 0.1, %v4841_v54  ;;  %v4843_v56 = vld [vmem:[#allocation44_spill] sm:$0xff] }
 0x30c   :  { %v1622_v5 = vadd.f32 %v4119_v20, %v1558_v37  ;;  %v1638_v39 = vadd.f32 %v4122_v16, %v1574_v49  ;;  %2528 = vmatpush3.bf16.msra.mxu1 %v1678_v36  ;;  %v2463_v14 = vpop.f32.mrb[60].mxu0  ;;  %v2511_v60 = vpop.f32.mrb[60].mxu1  ;;  %v4140_v37 = vmul.f32 0.1, %v4843_v56  ;;  %v4844_v49 = vld [vmem:[#allocation26_spill] sm:$0xff] }
 0x30d   :  { %v2464_v1 = vpop.f32.mrb[61].mxu0  ;;  %v2512_v21 = vpop.f32.mrb[61].mxu1  ;;  %4842 = vst [vmem:[#allocation31_spill] sm:$0xff] %v4137_v34  ;;  %v1653_v36 = vmul.f32 %v1621_v19, %v4844_v49  ;;  %v4845_v20 = vld [vmem:[#allocation22_spill] sm:$0xff] }
 0x30e   :  { %v1654_v6 = vmul.f32 %v1622_v5, %v4839_v33  ;;  %v2465_v47 = vadd.f32 %v2464_v1, %v2463_v14  ;;  %v2513_v7 = vadd.f32 %v2512_v21, %v2511_v60  ;;  %v2466_v25 = vpop.f32.mrb[62].mxu0  ;;  %v2514_v40 = vpop.f32.mrb[62].mxu1  ;;  %v1670_v10 = vmul.f32 %v1638_v39, %v4840_v61  ;;  %v4846_v21 = vld [vmem:[#allocation33_spill] sm:$0xff]  ;;  %v4849_v61 = vld [vmem:[#allocation43_spill] sm:$0xff] }
 0x30f   :  { %v2467_v16 = vpop.f32.mrb[63].mxu0  ;;  %v2515_v8 = vpop.f32.mrb[63].mxu1  ;;  %v1669_v43 = vmul.f32 %v1637_v62, %v4845_v20  ;;  %v4147_v39 = vmul.f32 0.1, %v4846_v21  ;;  %v4152_v56 = vmul.f32 0.1, %v4849_v61 }
 0x310   :  { %v1559_v5 = vmul.f32 %v2465_v47, %v4128_v44  ;;  %v1575_v14 = vmul.f32 %v2513_v7, %v4100_v11  ;;  %v2468_v60 = vadd.f32 %v2467_v16, %v2466_v25  ;;  %v2516_v1 = vadd.f32 %v2515_v8, %v2514_v40  ;;  %v4149_v54 = vpop.permute.xlu1 %1462  ;;  %v4850_v8 = vld [vmem:[#allocation36_spill] sm:$0xff]  ;;  %v4851_v61 = vld [vmem:[#allocation34_spill] sm:$0xff] }
 0x311   :  { %4847 = vst [vmem:[#allocation41_spill] sm:$0xff] %v4147_v39  ;;  %4848 = vst [vmem:[#allocation35_spill] sm:$0xff] %v4149_v54  ;;  %v1687_v33 = vpack.c.bf16 %v1670_v10, %v1669_v43  ;;  %v1679_v19 = vpack.c.bf16 %v1654_v6, %v1653_v36  ;;  %v4852_v43 = vld [vmem:[#allocation30_spill] sm:$0xff]  ;;  %v4853_v10 = vld [vmem:[#allocation29_spill] sm:$0xff] }
 0x312   :  { %v1623_v49 = vadd.f32 %v4137_v34, %v1559_v5  ;;  %v1639_v62 = vadd.f32 %v4140_v37, %v1575_v14  ;;  %v1560_v47 = vmul.f32 %v2468_v60, %v4149_v54  ;;  %v1576_v7 = vmul.f32 %v2516_v1, %v4126_v28  ;;  %v4854_v60 = vld [vmem:[#allocation45_spill] sm:$0xff] }
 0x313   :  { %2529 = vmatprep.subr.bf16.mxu1 %v1687_v33  ;;  %v4855_v33 = vld [vmem:[#allocation47_spill] sm:$0xff]  ;;  %v4856_v1 = vld [vmem:[#allocation49_spill] sm:$0xff] }
 0x314   :  { %v1624_v16 = vadd.f32 %v4147_v39, %v1560_v47  ;;  %v1640_v40 = vadd.f32 %v4152_v56, %v1576_v7  ;;  %2530 = vmatpush3.bf16.msra.mxu1 %v1679_v19  ;;  %v1655_v25 = vmul.f32 %v1623_v49, %v4850_v8  ;;  %v1671_v6 = vmul.f32 %v1639_v62, %v4852_v43  ;;  %v4857_v47 = vld [vmem:[#allocation51_spill] sm:$0xff]  ;;  %v4858_v19 = vld [vmem:[#allocation53_spill] sm:$0xff] }
 0x315   :  { %v4859_v49 = vld [vmem:[#allocation55_spill] sm:$0xff]  ;;  %v4860_v7 = vld [vmem:[#allocation57_spill] sm:$0xff] }
 0x316   :  { %v1656_v21 = vmul.f32 %v1624_v16, %v4851_v61  ;;  %v1672_v36 = vmul.f32 %v1640_v40, %v4853_v10  ;;  %v4861_v62 = vld [vmem:[#allocation59_spill] sm:$0xff]  ;;  %v4862_v16 = vld [vmem:[#allocation61_spill] sm:$0xff] }
 0x317   :  { %v4863_v40 = vld [vmem:[#allocation63_spill] sm:$0xff] }
 0x318   :  { %v1688_v5 = vpack.c.bf16 %v1672_v36, %v1671_v6  ;;  %v1680_v14 = vpack.c.bf16 %v1656_v21, %v1655_v25  ;;  %v4864_v25 = vld [vmem:[#allocation65_spill] sm:$0xff]  ;;  %v4865_v21 = vld [vmem:[#allocation67_spill] sm:$0xff] }
 0x319   :  { %v4866_v6 = vld [vmem:[#allocation69_spill] sm:$0xff]  ;;  %v4867_v36 = vld [vmem:[#allocation71_spill] sm:$0xff] }
 0x31a   :  { %2531 = vmatprep.subr.bf16.mxu1 %v1688_v5  ;;  %v4868_v5 = vld [vmem:[#allocation73_spill] sm:$0xff] }
 0x31b   :  { %2532 = vmatpush3.bf16.msra.mxu1 %v1680_v14  ;;  %v4182_v14 = vld [vmem:[%s4536_s1 + $0x84] ss:$8 sps:$4 sm:$0xff]  }
 0x31c   :  { %4869 = vst [vmem:[#allocation44_spill] sm:$0xff] %v4182_v14 }
 0x31e   :  { %1722 = vmatmul.mubr.bf16.vlgmr.msra.gmra.mrb[64].mxu1 %v4854_v60  ;;  %v4870_v60 = vld [vmem:[#allocation46_spill] sm:$0xff] }
 0x31f   :  { %1729 = vmatprep.mubr.bf16.mxu1 %v4855_v33  ;;  %v4871_v33 = vld [vmem:[#allocation48_spill] sm:$0xff] }
 0x326   :  { %1730 = vmatmul.mubr.bf16.gmra.mrb[68].mxu1 %v4856_v1  ;;  %v4872_v1 = vld [vmem:[#allocation50_spill] sm:$0xff] }
 0x327   :  { %1737 = vmatprep.mubr.bf16.mxu1 %v4857_v47  ;;  %v4873_v47 = vld [vmem:[#allocation52_spill] sm:$0xff] }
 0x32e   :  { %1738 = vmatmul.mubr.bf16.gmra.mrb[72].mxu1 %v4858_v19  ;;  %v4874_v19 = vld [vmem:[#allocation54_spill] sm:$0xff] }
 0x32f   :  { %1745 = vmatprep.mubr.bf16.mxu1 %v4859_v49  ;;  %v4875_v49 = vld [vmem:[#allocation56_spill] sm:$0xff] }
 0x336   :  { %1746 = vmatmul.mubr.bf16.gmra.mrb[76].mxu1 %v4860_v7  ;;  %v4876_v7 = vld [vmem:[#allocation58_spill] sm:$0xff] }
 0x337   :  { %1753 = vmatprep.mubr.bf16.mxu1 %v4861_v62  ;;  %v4877_v62 = vld [vmem:[#allocation60_spill] sm:$0xff] }
 0x33e   :  { %1754 = vmatmul.mubr.bf16.gmra.mrb[80].mxu1 %v4862_v16  ;;  %v4878_v16 = vld [vmem:[#allocation62_spill] sm:$0xff] }
 0x33f   :  { %1761 = vmatprep.mubr.bf16.mxu1 %v4863_v40  ;;  %v4879_v40 = vld [vmem:[#allocation64_spill] sm:$0xff] }
 0x346   :  { %1762 = vmatmul.mubr.bf16.gmra.mrb[84].mxu1 %v4864_v25  ;;  %v4880_v25 = vld [vmem:[#allocation66_spill] sm:$0xff] }
 0x347   :  { %1769 = vmatprep.mubr.bf16.mxu1 %v4865_v21  ;;  %v4881_v21 = vld [vmem:[#allocation68_spill] sm:$0xff] }
 0x34e   :  { %1770 = vmatmul.mubr.bf16.gmra.mrb[88].mxu1 %v4866_v6  ;;  %v4882_v6 = vld [vmem:[#allocation70_spill] sm:$0xff] }
 0x34f   :  { %1777 = vmatprep.mubr.bf16.mxu1 %v4867_v36  ;;  %v4883_v36 = vld [vmem:[#allocation72_spill] sm:$0xff] }
 0x356   :  { %1778 = vmatmul.mubr.bf16.gmra.mrb[92].mxu1 %v4868_v5  ;;  %v4884_v5 = vld [vmem:[#allocation74_spill] sm:$0xff] }
 0x357   :  { %1785 = vmatprep.mubr.bf16.mxu1 %v4182_v14  ;;  %v4887_v14 = vld [vmem:[#allocation87_spill] sm:$0xff] }
 0x35e   :  { %1786 = vmatmul.mubr.bf16.gmra.mrb[96].mxu1 %v4870_v60 }
 0x35f   :  { %1793 = vmatprep.mubr.bf16.mxu1 %v4871_v33 }
 0x366   :  { %1794 = vmatmul.mubr.bf16.gmra.mrb[100].mxu1 %v4872_v1 }
 0x367   :  { %1801 = vmatprep.mubr.bf16.mxu1 %v4873_v47 }
 0x36e   :  { %1802 = vmatmul.mubr.bf16.gmra.mrb[104].mxu1 %v4874_v19 }
 0x36f   :  { %1809 = vmatprep.mubr.bf16.mxu1 %v4875_v49 }
 0x376   :  { %1810 = vmatmul.mubr.bf16.gmra.mrb[108].mxu1 %v4876_v7 }
 0x377   :  { %1817 = vmatprep.mubr.bf16.mxu1 %v4877_v62  ;;  %v4885_v62 = vld [vmem:[#allocation85_spill] sm:$0xff] }
 0x37e   :  { %1818 = vmatmul.mubr.bf16.gmra.mrb[112].mxu1 %v4878_v16 }
 0x37f   :  { %1825 = vmatprep.mubr.bf16.mxu1 %v4879_v40  ;;  %v4886_v40 = vld [vmem:[#allocation77_spill] sm:$0xff] }
 0x386   :  { %1826 = vmatmul.mubr.bf16.gmra.mrb[116].mxu1 %v4880_v25 }
 0x387   :  { %1833 = vmatprep.mubr.bf16.mxu1 %v4881_v21 }
 0x38e   :  { %1834 = vmatmul.mubr.bf16.gmra.mrb[120].mxu1 %v4882_v6 }
 0x38f   :  { %1841 = vmatprep.mubr.bf16.mxu1 %v4883_v36 }
 0x396   :  { %1842 = vmatmul.mubr.bf16.gmra.mrb[124].mxu1 %v4884_v5 }
 0x3f1   :  { %v2533_v60 = vpop.f32.mrb[64].mxu1 }
 0x3f2   :  { %v2534_v33 = vpop.f32.mrb[65].mxu1 }
 0x3f3   :  { %v2535_v1 = vadd.f32 %v2534_v33, %v2533_v60  ;;  %v2536_v47 = vpop.f32.mrb[66].mxu1 }
 0x3f4   :  { %v2537_v19 = vpop.f32.mrb[67].mxu1 }
 0x3f5   :  { %v1850_v49 = vmul.f32 %v2535_v1, %v3912_v48  ;;  %v2538_v7 = vadd.f32 %v2537_v19, %v2536_v47 }
 0x3f7   :  { %v1882_v16 = vadd.f32 %v1850_v49, %v4885_v62  ;;  %v1851_v25 = vmul.f32 %v2538_v7, %v4886_v40 }
 0x3f9   :  { %v1883_v21 = vadd.f32 %v1851_v25, %v4887_v14  ;;  %v2539_v10 = vpop.f32.mrb[68].mxu1  ;;  %v4205_v36 = vmul.f32 %v1882_v16, %v3456_v15 }
 0x3fa   :  { %v2540_v6 = vpop.f32.mrb[69].mxu1 }
 0x3fb   :  { %v4208_v5 = vmul.f32 %v1883_v21, %v3469_v18  ;;  %v2541_v60 = vadd.f32 %v2540_v6, %v2539_v10  ;;  %v2542_v33 = vpop.f32.mrb[70].mxu1 }
 0x3fc   :  { %v2543_v43 = vpop.f32.mrb[71].mxu1 }
 0x3fd   :  { %v1852_v1 = vmul.f32 %v2541_v60, %v3920_v2  ;;  %v2544_v47 = vadd.f32 %v2543_v43, %v2542_v33 }
 0x3ff   :  { %v1884_v49 = vadd.f32 %v1852_v1, %v3973_v42  ;;  %v1853_v7 = vmul.f32 %v2544_v47, %v3922_v63 }
 0x401   :  { %v1885_v25 = vadd.f32 %v1853_v7, %v3979_v32  ;;  %v2545_v15 = vpop.f32.mrb[72].mxu1  ;;  %v4217_v18 = vmul.f32 %v1884_v49, %v3479_v23 }
 0x402   :  { %v2546_v16 = vpop.f32.mrb[73].mxu1 }
 0x403   :  { %v4220_v10 = vmul.f32 %v1885_v25, %v3477_v22  ;;  %v2547_v21 = vadd.f32 %v2546_v16, %v2545_v15  ;;  %v2548_v6 = vpop.f32.mrb[74].mxu1 }
 0x404   :  { %v2549_v43 = vpop.f32.mrb[75].mxu1 }
 0x405   :  { %v1854_v60 = vmul.f32 %v2547_v21, %v3928_v17  ;;  %v2550_v33 = vadd.f32 %v2549_v43, %v2548_v6 }
 0x407   :  { %v1886_v47 = vadd.f32 %v1854_v60, %v4001_v55  ;;  %v1855_v7 = vmul.f32 %v2550_v33, %v3930_v38 }
 0x409   :  { %v1887_v19 = vadd.f32 %v1855_v7, %v4007_v51  ;;  %v2551_v23 = vpop.f32.mrb[76].mxu1  ;;  %v4229_v22 = vmul.f32 %v1886_v47, %v3487_v27 }
 0x40a   :  { %v2552_v49 = vpop.f32.mrb[77].mxu1 }
 0x40b   :  { %v4232_v25 = vmul.f32 %v1887_v19, %v3485_v26  ;;  %v2553_v15 = vadd.f32 %v2552_v49, %v2551_v23  ;;  %v2554_v16 = vpop.f32.mrb[78].mxu1 }
 0x40c   :  { %v2555_v21 = vpop.f32.mrb[79].mxu1 }
 0x40d   :  { %v1856_v6 = vmul.f32 %v2553_v15, %v3936_v57  ;;  %v2556_v43 = vadd.f32 %v2555_v21, %v2554_v16 }
 0x40f   :  { %v1888_v33 = vadd.f32 %v1856_v6, %v4029_v29  ;;  %v1857_v7 = vmul.f32 %v2556_v43, %v3938_v46 }
 0x411   :  { %v1889_v1 = vadd.f32 %v1857_v7, %v4035_v59  ;;  %v2557_v27 = vpop.f32.mrb[80].mxu1  ;;  %v4241_v26 = vmul.f32 %v1888_v33, %v3495_v31 }
 0x412   :  { %v2558_v47 = vpop.f32.mrb[81].mxu1 }
 0x413   :  { %v4244_v19 = vmul.f32 %v1889_v1, %v3493_v30  ;;  %v2559_v23 = vadd.f32 %v2558_v47, %v2557_v27  ;;  %v2560_v49 = vpop.f32.mrb[82].mxu1 }
 0x414   :  { %v2561_v15 = vpop.f32.mrb[83].mxu1 }
 0x415   :  { %v1858_v16 = vmul.f32 %v2559_v23, %v3960_v35  ;;  %v2562_v21 = vadd.f32 %v2561_v15, %v2560_v49 }
 0x417   :  { %v1890_v43 = vadd.f32 %v1858_v16, %v4057_v13  ;;  %v1859_v7 = vmul.f32 %v2562_v21, %v3986_v12 }
 0x419   :  { %v1891_v60 = vadd.f32 %v1859_v7, %v4063_v4  ;;  %v2563_v31 = vpop.f32.mrb[84].mxu1  ;;  %v4253_v30 = vmul.f32 %v1890_v43, %v4815_v45 }
 0x41a   :  { %v2564_v33 = vpop.f32.mrb[85].mxu1 }
 0x41b   :  { %v4256_v1 = vmul.f32 %v1891_v60, %v4813_v0  ;;  %v2565_v27 = vadd.f32 %v2564_v33, %v2563_v31  ;;  %v2566_v47 = vpop.f32.mrb[86].mxu1 }
 0x41c   :  { %v2567_v23 = vpop.f32.mrb[87].mxu1 }
 0x41d   :  { %v1860_v49 = vmul.f32 %v2565_v27, %v4016_v58  ;;  %v2568_v15 = vadd.f32 %v2567_v23, %v2566_v47 }
 0x41f   :  { %v1892_v21 = vadd.f32 %v1860_v49, %v4085_v53  ;;  %v1861_v7 = vmul.f32 %v2568_v15, %v4042_v41  ;;  %v4890_v53 = vld [vmem:[#allocation26_spill] sm:$0xff] }
 0x421   :  { %v1893_v6 = vadd.f32 %v1861_v7, %v4091_v24  ;;  %v2569_v45 = vpop.f32.mrb[88].mxu1  ;;  %v4265_v0 = vmul.f32 %v1892_v21, %v4828_v50  ;;  %v4888_v7 = vld [vmem:[#allocation27_spill] sm:$0xff]  ;;  %v4889_v24 = vld [vmem:[#allocation20_spill] sm:$0xff] }
 0x422   :  { %v2570_v43 = vpop.f32.mrb[89].mxu1 }
 0x423   :  { %v4268_v60 = vmul.f32 %v1893_v6, %v4826_v52  ;;  %v2571_v31 = vadd.f32 %v2570_v43, %v2569_v45  ;;  %v2572_v33 = vpop.f32.mrb[90].mxu1  ;;  %v4891_v6 = vld [vmem:[#allocation24_spill] sm:$0xff] }
 0x424   :  { %v2573_v27 = vpop.f32.mrb[91].mxu1 }
 0x425   :  { %v1862_v47 = vmul.f32 %v2571_v31, %v4072_v3  ;;  %v2574_v23 = vadd.f32 %v2573_v27, %v2572_v33 }
 0x427   :  { %v1894_v15 = vadd.f32 %v1862_v47, %v4113_v9  ;;  %v1863_v16 = vmul.f32 %v2574_v23, %v4888_v7 }
 0x429   :  { %v1895_v41 = vadd.f32 %v1863_v16, %v4889_v24  ;;  %v2575_v50 = vpop.f32.mrb[92].mxu1  ;;  %v4277_v52 = vmul.f32 %v1894_v15, %v4890_v53 }
 0x42a   :  { %v2576_v21 = vpop.f32.mrb[93].mxu1 }
 0x42b   :  { %v4280_v45 = vmul.f32 %v1895_v41, %v4891_v6  ;;  %v2577_v43 = vadd.f32 %v2576_v21, %v2575_v50  ;;  %v2578_v31 = vpop.f32.mrb[94].mxu1 }
 0x42c   :  { %v2579_v33 = vpop.f32.mrb[95].mxu1 }
 0x42d   :  { %v1864_v27 = vmul.f32 %v2577_v43, %v4128_v44  ;;  %v2580_v49 = vadd.f32 %v2579_v33, %v2578_v31  ;;  %v4892_v31 = vld [vmem:[#allocation75_spill] sm:$0xff] }
 0x42f   :  { %v1896_v23 = vadd.f32 %v1864_v27, %v4137_v34  ;;  %v1865_v16 = vmul.f32 %v2580_v49, %v4149_v54  ;;  %v4893_v49 = vld [vmem:[#allocation86_spill] sm:$0xff]  ;;  %v4895_v34 = vld [vmem:[#allocation88_spill] sm:$0xff] }
 0x430   :  { %v4899_v27 = vld [vmem:[#allocation90_spill] sm:$0xff] }
 0x431   :  { %v1897_v24 = vadd.f32 %v1865_v16, %v4147_v39  ;;  %v2581_v53 = vpop.f32.mrb[96].mxu1  ;;  %v4289_v41 = vmul.f32 %v1896_v23, %v4850_v8  ;;  %v4894_v16 = vld [vmem:[#allocation76_spill] sm:$0xff] }
 0x432   :  { %v2582_v15 = vpop.f32.mrb[97].mxu1 }
 0x433   :  { %v4292_v50 = vmul.f32 %v1897_v24, %v4851_v61  ;;  %v2583_v21 = vadd.f32 %v2582_v15, %v2581_v53  ;;  %v2584_v6 = vpop.f32.mrb[98].mxu1  ;;  %v4896_v61 = vld [vmem:[#allocation5_spill] sm:$0xff]  ;;  %v4897_v15 = vld [vmem:[#allocation6_spill] sm:$0xff] }
 0x434   :  { %v2585_v43 = vpop.f32.mrb[99].mxu1 }
 0x435   :  { %v1866_v33 = vmul.f32 %v2583_v21, %v4892_v31  ;;  %v2586_v47 = vadd.f32 %v2585_v43, %v2584_v6  ;;  %v4898_v21 = vld [vmem:[#allocation78_spill] sm:$0xff] }
 0x437   :  { %v1898_v54 = vadd.f32 %v1866_v33, %v4893_v49  ;;  %v1867_v39 = vmul.f32 %v2586_v47, %v4894_v16  ;;  %v4900_v33 = vld [vmem:[#allocation79_spill] sm:$0xff] }
 0x438   :  { %v4902_v47 = vld [vmem:[#allocation91_spill] sm:$0xff] }
 0x439   :  { %v1899_v44 = vadd.f32 %v1867_v39, %v4895_v34  ;;  %v2587_v8 = vpop.f32.mrb[100].mxu1  ;;  %v1930_v53 = vmul.f32 %v1898_v54, %v4896_v61  ;;  %v4901_v39 = vpack.c.bf16 %v4208_v5, %v4205_v36  ;;  %v4908_v5 = vpack.c.bf16 %v4220_v10, %v4217_v18 }
 0x43a   :  { %v2588_v23 = vpop.f32.mrb[101].mxu1  ;;  %v4915_v10 = vpack.c.bf16 %v4232_v25, %v4229_v22  ;;  %v4922_v25 = vpack.c.bf16 %v4244_v19, %v4241_v26  ;;  %v4929_v19 = vpack.c.bf16 %v4256_v1, %v4253_v30  ;;  %v4936_v1 = vpack.c.bf16 %v4268_v60, %v4265_v0 }
 0x43b   :  { %v2589_v7 = vadd.f32 %v2588_v23, %v2587_v8  ;;  %v2590_v24 = vpop.f32.mrb[102].mxu1  ;;  %v1931_v9 = vmul.f32 %v1899_v44, %v4897_v15  ;;  %v4903_v15 = vld [vmem:[#allocation8_spill] sm:$0xff]  ;;  %v4939_v60 = vpack.c.bf16 %v4280_v45, %v4277_v52 }
 0x43c   :  { %v2591_v3 = vpop.f32.mrb[103].mxu1  ;;  %v2941_v52 = vld [vmem:[%s4536_s1 + $0x14] ss:$8 sps:$4 sm:$0xff]   ;;  %v2942_v45 = vld [vmem:[%s4536_s1 + $0x10] ss:$8 sps:$4 sm:$0xff]  }
 0x43d   :  { %v1868_v6 = vmul.f32 %v2589_v7, %v4898_v21  ;;  %v2592_v43 = vadd.f32 %v2591_v3, %v2590_v24  ;;  %v1954_v31 = vpack.c.bf16 %v1931_v9, %v1930_v53  ;;  %v4904_v7 = vld [vmem:[#allocation7_spill] sm:$0xff]  ;;  %v4905_v24 = vld [vmem:[#allocation80_spill] sm:$0xff] }
 0x43f   :  { %v1900_v58 = vadd.f32 %v1868_v6, %v4899_v27  ;;  %v1869_v49 = vmul.f32 %v2592_v43, %v4900_v33  ;;  %2629 = vmatprep.subr.bf16.mxu0 %v1954_v31  ;;  %v4906_v31 = vld [vmem:[#allocation93_spill] sm:$0xff] }
 0x440   :  { %2630 = vmatpush3.bf16.msra.mxu0 %v4901_v39  ;;  %v4907_v27 = vld [vmem:[#allocation81_spill] sm:$0xff] }
 0x441   :  { %v1901_v8 = vadd.f32 %v1869_v49, %v4902_v47  ;;  %v2593_v23 = vpop.f32.mrb[104].mxu1  ;;  %v1932_v34 = vmul.f32 %v1900_v58, %v4903_v15  ;;  %v4909_v49 = vld [vmem:[#allocation94_spill] sm:$0xff] }
 0x442   :  { %v2594_v54 = vpop.f32.mrb[105].mxu1  ;;  %v4910_v15 = vld [vmem:[#allocation10_spill] sm:$0xff] }
 0x443   :  { %v2595_v61 = vadd.f32 %v2594_v54, %v2593_v23  ;;  %v2596_v44 = vpop.f32.mrb[106].mxu1  ;;  %v1933_v3 = vmul.f32 %v1901_v8, %v4904_v7 }
 0x444   :  { %v2597_v9 = vpop.f32.mrb[107].mxu1 }
 0x445   :  { %v1870_v53 = vmul.f32 %v2595_v61, %v4905_v24  ;;  %v2598_v6 = vadd.f32 %v2597_v9, %v2596_v44  ;;  %v1955_v43 = vpack.c.bf16 %v1933_v3, %v1932_v34  ;;  %v4911_v61 = vld [vmem:[#allocation9_spill] sm:$0xff]  ;;  %v4912_v3 = vld [vmem:[#allocation82_spill] sm:$0xff] }
 0x447   :  { %v1902_v33 = vadd.f32 %v1870_v53, %v4906_v31  ;;  %v1871_v36 = vmul.f32 %v2598_v6, %v4907_v27  ;;  %2631 = vmatprep.subr.bf16.mxu0 %v1955_v43  ;;  %v4913_v43 = vld [vmem:[#allocation97_spill] sm:$0xff]  ;;  %v4914_v31 = vld [vmem:[#allocation83_spill] sm:$0xff] }
 0x448   :  { %2632 = vmatpush3.bf16.msra.mxu0 %v4908_v5 }
 0x449   :  { %v1903_v39 = vadd.f32 %v1871_v36, %v4909_v49  ;;  %v2599_v23 = vpop.f32.mrb[108].mxu1  ;;  %v1934_v7 = vmul.f32 %v1902_v33, %v4910_v15  ;;  %v4916_v36 = vld [vmem:[#allocation98_spill] sm:$0xff]  ;;  %v4917_v15 = vld [vmem:[#allocation12_spill] sm:$0xff] }
 0x44a   :  { %v2600_v58 = vpop.f32.mrb[109].mxu1 }
 0x44b   :  { %v2601_v54 = vadd.f32 %v2600_v58, %v2599_v23  ;;  %v2602_v8 = vpop.f32.mrb[110].mxu1  ;;  %v1935_v44 = vmul.f32 %v1903_v39, %v4911_v61 }
 0x44c   :  { %v2603_v34 = vpop.f32.mrb[111].mxu1 }
 0x44d   :  { %v1872_v9 = vmul.f32 %v2601_v54, %v4912_v3  ;;  %v2604_v53 = vadd.f32 %v2603_v34, %v2602_v8  ;;  %v1956_v6 = vpack.c.bf16 %v1935_v44, %v1934_v7  ;;  %v4918_v54 = vld [vmem:[#allocation11_spill] sm:$0xff]  ;;  %v4919_v44 = vld [vmem:[#allocation84_spill] sm:$0xff] }
 0x44f   :  { %v1904_v27 = vadd.f32 %v1872_v9, %v4913_v43  ;;  %v1873_v18 = vmul.f32 %v2604_v53, %v4914_v31  ;;  %2633 = vmatprep.subr.bf16.mxu0 %v1956_v6  ;;  %v4920_v6 = vld [vmem:[#allocation25_spill] sm:$0xff] }
 0x450   :  { %2634 = vmatpush3.bf16.msra.mxu0 %v4915_v10  ;;  %v4921_v43 = vld [vmem:[#allocation89_spill] sm:$0xff] }
 0x451   :  { %v1905_v5 = vadd.f32 %v1873_v18, %v4916_v36  ;;  %v2605_v23 = vpop.f32.mrb[112].mxu1  ;;  %v1936_v61 = vmul.f32 %v1904_v27, %v4917_v15  ;;  %v4923_v18 = vld [vmem:[#allocation38_spill] sm:$0xff] }
 0x452   :  { %v2606_v33 = vpop.f32.mrb[113].mxu1  ;;  %v4924_v15 = vld [vmem:[#allocation14_spill] sm:$0xff] }
 0x453   :  { %v2607_v58 = vadd.f32 %v2606_v33, %v2605_v23  ;;  %v2608_v39 = vpop.f32.mrb[114].mxu1  ;;  %v1937_v8 = vmul.f32 %v1905_v5, %v4918_v54 }
 0x454   :  { %v2609_v7 = vpop.f32.mrb[115].mxu1 }
 0x455   :  { %v1874_v34 = vmul.f32 %v2607_v58, %v4919_v44  ;;  %v2610_v9 = vadd.f32 %v2609_v7, %v2608_v39  ;;  %v1957_v53 = vpack.c.bf16 %v1937_v8, %v1936_v61  ;;  %v4925_v58 = vld [vmem:[#allocation13_spill] sm:$0xff]  ;;  %v4926_v8 = vld [vmem:[#allocation92_spill] sm:$0xff] }
 0x457   :  { %v1906_v31 = vadd.f32 %v1874_v34, %v4920_v6  ;;  %v1875_v22 = vmul.f32 %v2610_v9, %v4921_v43  ;;  %2635 = vmatprep.subr.bf16.mxu0 %v1957_v53  ;;  %v4927_v53 = vld [vmem:[#allocation16_spill] sm:$0xff]  ;;  %v4928_v6 = vld [vmem:[#allocation95_spill] sm:$0xff] }
 0x458   :  { %2636 = vmatpush3.bf16.msra.mxu0 %v4922_v25 }
 0x459   :  { %v1907_v10 = vadd.f32 %v1875_v22, %v4923_v18  ;;  %v2611_v23 = vpop.f32.mrb[116].mxu1  ;;  %v1938_v54 = vmul.f32 %v1906_v31, %v4924_v15  ;;  %v4930_v22 = vld [vmem:[#allocation40_spill] sm:$0xff]  ;;  %v4931_v15 = vld [vmem:[#allocation18_spill] sm:$0xff] }
 0x45a   :  { %v2612_v27 = vpop.f32.mrb[117].mxu1 }
 0x45b   :  { %v2613_v33 = vadd.f32 %v2612_v27, %v2611_v23  ;;  %v2614_v5 = vpop.f32.mrb[118].mxu1  ;;  %v1939_v39 = vmul.f32 %v1907_v10, %v4925_v58 }
 0x45c   :  { %v2615_v61 = vpop.f32.mrb[119].mxu1 }
 0x45d   :  { %v1876_v7 = vmul.f32 %v2613_v33, %v4926_v8  ;;  %v2616_v34 = vadd.f32 %v2615_v61, %v2614_v5  ;;  %v1958_v9 = vpack.c.bf16 %v1939_v39, %v1938_v54  ;;  %v4932_v33 = vld [vmem:[#allocation17_spill] sm:$0xff]  ;;  %v4933_v39 = vld [vmem:[#allocation100_spill] sm:$0xff] }
 0x45f   :  { %v1908_v43 = vadd.f32 %v1876_v7, %v4927_v53  ;;  %v1877_v26 = vmul.f32 %v2616_v34, %v4928_v6  ;;  %2637 = vmatprep.subr.bf16.mxu0 %v1958_v9  ;;  %v4934_v9 = vld [vmem:[#allocation19_spill] sm:$0xff] }
 0x460   :  { %2638 = vmatpush3.bf16.msra.mxu0 %v4929_v19  ;;  %v4935_v53 = vld [vmem:[#allocation23_spill] sm:$0xff] }
 0x461   :  { %v1909_v25 = vadd.f32 %v1877_v26, %v4930_v22  ;;  %v2617_v23 = vpop.f32.mrb[120].mxu1  ;;  %v1940_v58 = vmul.f32 %v1908_v43, %v4931_v15  ;;  %v4937_v26 = vld [vmem:[#allocation32_spill] sm:$0xff] }
 0x462   :  { %v2618_v31 = vpop.f32.mrb[121].mxu1 }
 0x463   :  { %v2619_v27 = vadd.f32 %v2618_v31, %v2617_v23  ;;  %v2620_v10 = vpop.f32.mrb[122].mxu1  ;;  %v1941_v5 = vmul.f32 %v1909_v25, %v4932_v33 }
 0x464   :  { %v2621_v54 = vpop.f32.mrb[123].mxu1 }
 0x465   :  { %v1878_v61 = vmul.f32 %v2619_v27, %v4933_v39  ;;  %v2622_v7 = vadd.f32 %v2621_v54, %v2620_v10  ;;  %v1959_v34 = vpack.c.bf16 %v1941_v5, %v1940_v58  ;;  %v4938_v27 = vld [vmem:[#allocation21_spill] sm:$0xff] }
 0x467   :  { %v1910_v6 = vadd.f32 %v1878_v61, %v4934_v9  ;;  %v1879_v30 = vmul.f32 %v2622_v7, %v4935_v53  ;;  %2639 = vmatprep.subr.bf16.mxu0 %v1959_v34  ;;  %v4940_v34 = vld [vmem:[#allocation30_spill] sm:$0xff] }
 0x468   :  { %2640 = vmatpush3.bf16.msra.mxu0 %v4936_v1 }
 0x469   :  { %v1911_v19 = vadd.f32 %v1879_v30, %v4937_v26  ;;  %v2623_v23 = vpop.f32.mrb[124].mxu1  ;;  %v1942_v15 = vmul.f32 %v1910_v6, %v4845_v20  ;;  %v4941_v6 = vld [vmem:[#allocation29_spill] sm:$0xff] }
 0x46a   :  { %v2624_v43 = vpop.f32.mrb[125].mxu1 }
 0x46b   :  { %v2625_v31 = vadd.f32 %v2624_v43, %v2623_v23  ;;  %v2626_v25 = vpop.f32.mrb[126].mxu1  ;;  %v1943_v10 = vmul.f32 %v1911_v19, %v4938_v27  ;;  %v4942_v19 = vpack.c.bf16 %v4292_v50, %v4289_v41  ;;  %v2940_v23 = vld [vmem:[%s4536_s1] ss:$8 sps:$4 sm:$0xff]   ;;  %v2943_v41 = vld [vmem:[%s4536_s1 + $0x24] ss:$8 sps:$4 sm:$0xff]  }
 0x46c   :  { %v2627_v58 = vpop.f32.mrb[127].mxu1  ;;  %v2944_v50 = vld [vmem:[%s4536_s1 + $0x20] ss:$8 sps:$4 sm:$0xff]   ;;  %v2945_v43 = vld [vmem:[%s4536_s1 + $0x34] ss:$8 sps:$4 sm:$0xff]  }
 0x46d   :  { %v1880_v33 = vmul.f32 %v2625_v31, %v4100_v11  ;;  %v2628_v5 = vadd.f32 %v2627_v58, %v2626_v25  ;;  %v1960_v54 = vpack.c.bf16 %v1943_v10, %v1942_v15  ;;  %v2946_v31 = vld [vmem:[%s4536_s1 + $0x30] ss:$8 sps:$4 sm:$0xff]   ;;  %v2947_v25 = vld [vmem:[%s4536_s1 + $0x44] ss:$8 sps:$4 sm:$0xff]   ;;  %v2948_v15 = vld [vmem:[%s4536_s1 + $0x40] ss:$8 sps:$4 sm:$0xff]  }
 0x46e   :  { %v2949_v27 = vld [vmem:[%s4536_s1 + $0x54] ss:$8 sps:$4 sm:$0xff]   ;;  %v2950_v10 = vld [vmem:[%s4536_s1 + $0x50] ss:$8 sps:$4 sm:$0xff]   ;;  %v2951_v58 = vld [vmem:[%s4536_s1 + $0x64] ss:$8 sps:$4 sm:$0xff]  }
 0x46f   :  { %v1912_v61 = vadd.f32 %v1880_v33, %v4140_v37  ;;  %v1881_v0 = vmul.f32 %v2628_v5, %v4126_v28  ;;  %2641 = vmatprep.subr.bf16.mxu0 %v1960_v54  ;;  %v2952_v33 = vld [vmem:[%s4536_s1 + $0x60] ss:$8 sps:$4 sm:$0xff]   ;;  %v2953_v5 = vld [vmem:[%s4536_s1 + $0x74] ss:$8 sps:$4 sm:$0xff]   ;;  %v2954_v54 = vld [vmem:[%s4536_s1 + $0x70] ss:$8 sps:$4 sm:$0xff]  }
 0x470   :  { %2642 = vmatpush3.bf16.msra.mxu0 %v4939_v60  ;;  %v2956_v60 = vld [vmem:[%s4536_s1 + $0x94] ss:$8 sps:$4 sm:$0xff]  }
 0x471   :  { %v1913_v7 = vadd.f32 %v1881_v0, %v4152_v56  ;;  %v1944_v20 = vmul.f32 %v1912_v61, %v4940_v34  ;;  %v4943_v61 = vld [vmem:[#allocation44_spill] sm:$0xff]  ;;  %v2955_v0 = vld [vmem:[%s4536_s1 + $0x80] ss:$8 sps:$4 sm:$0xff]   ;;  %v2958_v34 = vld [vmem:[%s4536_s1 + $0xa4] ss:$8 sps:$4 sm:$0xff]  }
 0x473   :  { %v1945_v30 = vmul.f32 %v1913_v7, %v4941_v6  ;;  %v2957_v7 = vld [vmem:[%s4536_s1 + $0x90] ss:$8 sps:$4 sm:$0xff]   ;;  %v2960_v6 = vld [vmem:[%s4536_s1 + $0xb4] ss:$8 sps:$4 sm:$0xff]  }
 0x475   :  { %v1961_v1 = vpack.c.bf16 %v1945_v30, %v1944_v20  ;;  %v2959_v20 = vld [vmem:[%s4536_s1 + $0xa0] ss:$8 sps:$4 sm:$0xff]   ;;  %v2961_v30 = vld [vmem:[%s4536_s1 + $0xb0] ss:$8 sps:$4 sm:$0xff]  }
 0x477   :  { %2643 = vmatprep.subr.bf16.mxu0 %v1961_v1  ;;  %v2962_v1 = vld [vmem:[%s4536_s1 + $0xc4] ss:$8 sps:$4 sm:$0xff]  }
 0x478   :  { %2644 = vmatpush3.bf16.msra.mxu0 %v4942_v19  ;;  %v2963_v19 = vld [vmem:[%s4536_s1 + $0xc0] ss:$8 sps:$4 sm:$0xff]  }
 0x47b   :  { %1995 = vmatmul.mubr.bf16.vlgmr.msra.gmra.mrb[64].mxu0 %v2940_v23  ;;  %v2964_v23 = vld [vmem:[%s4536_s1 + $0xd4] ss:$8 sps:$4 sm:$0xff]  }
 0x47c   :  { %2002 = vmatprep.mubr.bf16.mxu0 %v2941_v52  ;;  %v2965_v52 = vld [vmem:[%s4536_s1 + $0xd0] ss:$8 sps:$4 sm:$0xff]  }
 0x483   :  { %2003 = vmatmul.mubr.bf16.gmra.mrb[68].mxu0 %v2942_v45  ;;  %v2966_v45 = vld [vmem:[%s4536_s1 + $0xe4] ss:$8 sps:$4 sm:$0xff]  }
 0x484   :  { %2010 = vmatprep.mubr.bf16.mxu0 %v2943_v41  ;;  %v2967_v41 = vld [vmem:[%s4536_s1 + $0xe0] ss:$8 sps:$4 sm:$0xff]  }
 0x48b   :  { %2011 = vmatmul.mubr.bf16.gmra.mrb[72].mxu0 %v2944_v50  ;;  %v2968_v50 = vld [vmem:[%s4536_s1 + $0xf4] ss:$8 sps:$4 sm:$0xff]  }
 0x48c   :  { %2018 = vmatprep.mubr.bf16.mxu0 %v2945_v43  ;;  %v2969_v43 = vld [vmem:[%s4536_s1 + $0xf0] ss:$8 sps:$4 sm:$0xff]   ;;  %s2995_s1 = smov [#allocation2]  }
 0x48d   :  { %s2224_s26 = sshll.u32 %s2995_s1, 4  ;;  %s2225_s26 = int_to_ptr.vmem [resolvable:$true] %s2224_s26 }
 0x48e   :  { %s2970_s27 = scalar_lea.vmem %s2225_s26, 4096  ;;  %p2975_p1 = scmp.lt.s32.totalorder %s2225_s26, %s2225_s26 }
 0x48f   :  { %p2971_p0 = scmp.ne.s32.totalorder %s2225_s26, %s2970_s27  ;;  %p2976_p2 = scmp.lt.s32.totalorder %s2970_s27, %s2970_s27 }
 0x491   :  { %p2977_p3 = por %p2976_p2, %p2975_p1 }
 0x493   :  { %2019 = vmatmul.mubr.bf16.gmra.mrb[76].mxu0 %v2946_v31  ;;  %p2978_p4 = pnand %p2977_p3, %p2971_p0 }
 0x494   :  { %2026 = vmatprep.mubr.bf16.mxu0 %v2947_v25 }
 0x49b   :  { %2027 = vmatmul.mubr.bf16.gmra.mrb[80].mxu0 %v2948_v15 }
 0x49c   :  { %2034 = vmatprep.mubr.bf16.mxu0 %v2949_v27 }
 0x4a3   :  { %2035 = vmatmul.mubr.bf16.gmra.mrb[84].mxu0 %v2950_v10 }
 0x4a4   :  { %2042 = vmatprep.mubr.bf16.mxu0 %v2951_v58 }
 0x4ab   :  { %2043 = vmatmul.mubr.bf16.gmra.mrb[88].mxu0 %v2952_v33 }
 0x4ac   :  { %2050 = vmatprep.mubr.bf16.mxu0 %v2953_v5 }
 0x4b3   :  { %2051 = vmatmul.mubr.bf16.gmra.mrb[92].mxu0 %v2954_v54 }
 0x4b4   :  { %2058 = vmatprep.mubr.bf16.mxu0 %v4943_v61 }
 0x4bb   :  { %2059 = vmatmul.mubr.bf16.gmra.mrb[96].mxu0 %v2955_v0 }
 0x4bc   :  { %2066 = vmatprep.mubr.bf16.mxu0 %v2956_v60 }
 0x4c3   :  { %2067 = vmatmul.mubr.bf16.gmra.mrb[100].mxu0 %v2957_v7 }
 0x4c4   :  { %2074 = vmatprep.mubr.bf16.mxu0 %v2958_v34 }
 0x4cb   :  { %2075 = vmatmul.mubr.bf16.gmra.mrb[104].mxu0 %v2959_v20 }
 0x4cc   :  { %2082 = vmatprep.mubr.bf16.mxu0 %v2960_v6 }
 0x4d3   :  { %2083 = vmatmul.mubr.bf16.gmra.mrb[108].mxu0 %v2961_v30 }
 0x4d4   :  { %2090 = vmatprep.mubr.bf16.mxu0 %v2962_v1 }
 0x4db   :  { %2091 = vmatmul.mubr.bf16.gmra.mrb[112].mxu0 %v2963_v19 }
 0x4dc   :  { %2098 = vmatprep.mubr.bf16.mxu0 %v2964_v23 }
 0x4e3   :  { %2099 = vmatmul.mubr.bf16.gmra.mrb[116].mxu0 %v2965_v52 }
 0x4e4   :  { %2106 = vmatprep.mubr.bf16.mxu0 %v2966_v45 }
 0x4eb   :  { %2107 = vmatmul.mubr.bf16.gmra.mrb[120].mxu0 %v2967_v41 }
 0x4ec   :  { %2114 = vmatprep.mubr.bf16.mxu0 %v2968_v50 }
 0x4f3   :  { %2115 = vmatmul.mubr.bf16.gmra.mrb[124].mxu0 %v2969_v43 }
 0x54e   :  { %v2645_v31 = vpop.f32.mrb[64].mxu0 }
 0x54f   :  { %v2646_v25 = vpop.f32.mrb[65].mxu0 }
 0x550   :  { %v2647_v15 = vadd.f32 %v2646_v25, %v2645_v31  ;;  %v2648_v27 = vpop.f32.mrb[66].mxu0 }
 0x551   :  { %v2649_v10 = vpop.f32.mrb[67].mxu0 }
 0x552   :  { %v2123_v58 = vmul.f32 %v2647_v15, %v3912_v48  ;;  %v2650_v33 = vadd.f32 %v2649_v10, %v2648_v27 }
 0x554   :  { %v2155_v5 = vadd.f32 %v2123_v58, %v4885_v62  ;;  %v2124_v54 = vmul.f32 %v2650_v33, %v4886_v40 }
 0x556   :  { %2187 = vst [vmem:[#allocation2] sm:$0xff] %v2155_v5  ;;  %v2156_v61 = vadd.f32 %v2124_v54, %v4887_v14  ;;  %v2651_v0 = vpop.f32.mrb[68].mxu0 }
 0x557   :  { %v2652_v60 = vpop.f32.mrb[69].mxu0 }
 0x558   :  { %2188 = vst [vmem:[#allocation2 + $0x8] sm:$0xff] %v2156_v61  ;;  %v2653_v7 = vadd.f32 %v2652_v60, %v2651_v0  ;;  %v2654_v34 = vpop.f32.mrb[70].mxu0 }
 0x559   :  { %v2655_v20 = vpop.f32.mrb[71].mxu0 }
 0x55a   :  { %v2125_v6 = vmul.f32 %v2653_v7, %v3920_v2  ;;  %v2656_v30 = vadd.f32 %v2655_v20, %v2654_v34  ;;  %v4944_v20 = vld [vmem:[#allocation96_spill] sm:$0xff] }
 0x55c   :  { %v2157_v1 = vadd.f32 %v2125_v6, %v3973_v42  ;;  %v2126_v48 = vmul.f32 %v2656_v30, %v3922_v63 }
 0x55e   :  { %2189 = vst [vmem:[#allocation2 + $0x10] sm:$0xff] %v2157_v1  ;;  %v2158_v62 = vadd.f32 %v2126_v48, %v3979_v32  ;;  %v2657_v40 = vpop.f32.mrb[72].mxu0  ;;  %v4945_v1 = vld [vmem:[#allocation15_spill] sm:$0xff] }
 0x55f   :  { %v2658_v19 = vpop.f32.mrb[73].mxu0 }
 0x560   :  { %2190 = vst [vmem:[#allocation2 + $0x18] sm:$0xff] %v2158_v62  ;;  %v2659_v14 = vadd.f32 %v2658_v19, %v2657_v40  ;;  %v2660_v23 = vpop.f32.mrb[74].mxu0 }
 0x561   :  { %v2661_v52 = vpop.f32.mrb[75].mxu0 }
 0x562   :  { %v2127_v45 = vmul.f32 %v2659_v14, %v3928_v17  ;;  %v2662_v41 = vadd.f32 %v2661_v52, %v2660_v23  ;;  %v4948_v52 = vld [vmem:[#allocation37_spill] sm:$0xff] }
 0x564   :  { %v2159_v50 = vadd.f32 %v2127_v45, %v4001_v55  ;;  %v2128_v2 = vmul.f32 %v2662_v41, %v3930_v38 }
 0x566   :  { %2191 = vst [vmem:[#allocation2 + $0x20] sm:$0xff] %v2159_v50  ;;  %v2160_v42 = vadd.f32 %v2128_v2, %v4007_v51  ;;  %v2663_v63 = vpop.f32.mrb[76].mxu0  ;;  %v4949_v50 = vld [vmem:[#allocation39_spill] sm:$0xff] }
 0x567   :  { %v2664_v43 = vpop.f32.mrb[77].mxu0 }
 0x568   :  { %2192 = vst [vmem:[#allocation2 + $0x28] sm:$0xff] %v2160_v42  ;;  %v2665_v32 = vadd.f32 %v2664_v43, %v2663_v63  ;;  %v2666_v31 = vpop.f32.mrb[78].mxu0  ;;  %v4950_v42 = vld [vmem:[#allocation27_spill] sm:$0xff]  ;;  %v4951_v43 = vld [vmem:[#allocation20_spill] sm:$0xff] }
 0x569   :  { %v2667_v25 = vpop.f32.mrb[79].mxu0 }
 0x56a   :  { %v2129_v15 = vmul.f32 %v2665_v32, %v3936_v57  ;;  %v2668_v27 = vadd.f32 %v2667_v25, %v2666_v31 }
 0x56c   :  { %v2161_v10 = vadd.f32 %v2129_v15, %v4029_v29  ;;  %v2130_v17 = vmul.f32 %v2668_v27, %v3938_v46 }
 0x56e   :  { %2193 = vst [vmem:[#allocation2 + $0x30] sm:$0xff] %v2161_v10  ;;  %v2162_v55 = vadd.f32 %v2130_v17, %v4035_v59  ;;  %v2669_v38 = vpop.f32.mrb[80].mxu0  ;;  %v4952_v17 = vld [vmem:[#allocation42_spill] sm:$0xff] }
 0x56f   :  { %v2670_v58 = vpop.f32.mrb[81].mxu0 }
 0x570   :  { %2194 = vst [vmem:[#allocation2 + $0x38] sm:$0xff] %v2162_v55  ;;  %v2671_v51 = vadd.f32 %v2670_v58, %v2669_v38  ;;  %v2672_v33 = vpop.f32.mrb[82].mxu0  ;;  %v4953_v58 = vld [vmem:[#allocation31_spill] sm:$0xff] }
 0x571   :  { %v2673_v5 = vpop.f32.mrb[83].mxu0 }
 0x572   :  { %v2131_v54 = vmul.f32 %v2671_v51, %v3960_v35  ;;  %v2674_v61 = vadd.f32 %v2673_v5, %v2672_v33  ;;  %v4946_v35 = vld [vmem:[#allocation99_spill] sm:$0xff] }
 0x573   :  { %v4954_v33 = vld [vmem:[#allocation35_spill] sm:$0xff] }
 0x574   :  { %v2163_v0 = vadd.f32 %v2131_v54, %v4057_v13  ;;  %v2132_v57 = vmul.f32 %v2674_v61, %v3986_v12  ;;  %v4947_v13 = vld [vmem:[#allocation28_spill] sm:$0xff]  ;;  %v4955_v54 = vld [vmem:[#allocation41_spill] sm:$0xff] }
 0x576   :  { %2195 = vst [vmem:[#allocation2 + $0x40] sm:$0xff] %v2163_v0  ;;  %v2164_v29 = vadd.f32 %v2132_v57, %v4063_v4  ;;  %v2675_v46 = vpop.f32.mrb[84].mxu0 }
 0x577   :  { %v2676_v60 = vpop.f32.mrb[85].mxu0 }
 0x578   :  { %2196 = vst [vmem:[#allocation2 + $0x48] sm:$0xff] %v2164_v29  ;;  %v2677_v59 = vadd.f32 %v2676_v60, %v2675_v46  ;;  %v2678_v7 = vpop.f32.mrb[86].mxu0 }
 0x579   :  { %v2679_v34 = vpop.f32.mrb[87].mxu0 }
 0x57a   :  { %v2133_v6 = vmul.f32 %v2677_v59, %v4944_v20  ;;  %v2680_v30 = vadd.f32 %v2679_v34, %v2678_v7  ;;  %v4956_v59 = vld [vmem:[#allocation75_spill] sm:$0xff]  ;;  %v4957_v20 = vld [vmem:[#allocation86_spill] sm:$0xff] }
 0x57c   :  { %v2165_v48 = vadd.f32 %v2133_v6, %v4945_v1  ;;  %v2134_v62 = vmul.f32 %v2680_v30, %v4946_v35  ;;  %v4958_v1 = vld [vmem:[#allocation88_spill] sm:$0xff] }
 0x57e   :  { %2197 = vst [vmem:[#allocation2 + $0x50] sm:$0xff] %v2165_v48  ;;  %v2166_v40 = vadd.f32 %v2134_v62, %v4947_v13  ;;  %v2681_v12 = vpop.f32.mrb[88].mxu0 }
 0x57f   :  { %v2682_v19 = vpop.f32.mrb[89].mxu0 }
 0x580   :  { %2198 = vst [vmem:[#allocation2 + $0x58] sm:$0xff] %v2166_v40  ;;  %v2683_v4 = vadd.f32 %v2682_v19, %v2681_v12  ;;  %v2684_v14 = vpop.f32.mrb[90].mxu0 }
 0x581   :  { %v2685_v23 = vpop.f32.mrb[91].mxu0 }
 0x582   :  { %v2135_v45 = vmul.f32 %v2683_v4, %v4948_v52  ;;  %v2686_v41 = vadd.f32 %v2685_v23, %v2684_v14  ;;  %v4959_v14 = vld [vmem:[#allocation90_spill] sm:$0xff]  ;;  %v4960_v52 = vld [vmem:[#allocation79_spill] sm:$0xff] }
 0x584   :  { %v2167_v2 = vadd.f32 %v2135_v45, %v4949_v50  ;;  %v2136_v63 = vmul.f32 %v2686_v41, %v4950_v42 }
 0x586   :  { %2199 = vst [vmem:[#allocation2 + $0x60] sm:$0xff] %v2167_v2  ;;  %v2168_v32 = vadd.f32 %v2136_v63, %v4951_v43  ;;  %v2687_v31 = vpop.f32.mrb[92].mxu0 }
 0x587   :  { %v2688_v25 = vpop.f32.mrb[93].mxu0 }
 0x588   :  { %2200 = vst [vmem:[#allocation2 + $0x68] sm:$0xff] %v2168_v32  ;;  %v2689_v15 = vadd.f32 %v2688_v25, %v2687_v31  ;;  %v2690_v27 = vpop.f32.mrb[94].mxu0  ;;  %v4961_v31 = vld [vmem:[#allocation93_spill] sm:$0xff] }
 0x589   :  { %v2691_v10 = vpop.f32.mrb[95].mxu0 }
 0x58a   :  { %v2137_v55 = vmul.f32 %v2689_v15, %v4952_v17  ;;  %v2692_v38 = vadd.f32 %v2691_v10, %v2690_v27 }
 0x58c   :  { %v2169_v51 = vadd.f32 %v2137_v55, %v4953_v58  ;;  %v2138_v5 = vmul.f32 %v2692_v38, %v4954_v33  ;;  %v4963_v33 = vld [vmem:[#allocation97_spill] sm:$0xff] }
 0x58e   :  { %2201 = vst [vmem:[#allocation2 + $0x70] sm:$0xff] %v2169_v51  ;;  %v2170_v61 = vadd.f32 %v2138_v5, %v4955_v54  ;;  %v2693_v0 = vpop.f32.mrb[96].mxu0 }
 0x58f   :  { %v2694_v57 = vpop.f32.mrb[97].mxu0 }
 0x590   :  { %2202 = vst [vmem:[#allocation2 + $0x78] sm:$0xff] %v2170_v61  ;;  %v2695_v29 = vadd.f32 %v2694_v57, %v2693_v0  ;;  %v2696_v46 = vpop.f32.mrb[98].mxu0 }
 0x591   :  { %v2697_v60 = vpop.f32.mrb[99].mxu0 }
 0x592   :  { %v2139_v7 = vmul.f32 %v2695_v29, %v4956_v59  ;;  %v2698_v34 = vadd.f32 %v2697_v60, %v2696_v46 }
 0x594   :  { %v2171_v6 = vadd.f32 %v2139_v7, %v4957_v20  ;;  %v2140_v30 = vmul.f32 %v2698_v34, %v4894_v16  ;;  %v4965_v7 = vld [vmem:[#allocation25_spill] sm:$0xff] }
 0x596   :  { %2203 = vst [vmem:[#allocation2 + $0x80] sm:$0xff] %v2171_v6  ;;  %v2172_v48 = vadd.f32 %v2140_v30, %v4958_v1  ;;  %v2699_v35 = vpop.f32.mrb[100].mxu0 }
 0x597   :  { %v2700_v62 = vpop.f32.mrb[101].mxu0 }
 0x598   :  { %2204 = vst [vmem:[#allocation2 + $0x88] sm:$0xff] %v2172_v48  ;;  %v2701_v13 = vadd.f32 %v2700_v62, %v2699_v35  ;;  %v2702_v40 = vpop.f32.mrb[102].mxu0 }
 0x599   :  { %v2703_v12 = vpop.f32.mrb[103].mxu0 }
 0x59a   :  { %v2141_v19 = vmul.f32 %v2701_v13, %v4898_v21  ;;  %v2704_v4 = vadd.f32 %v2703_v12, %v2702_v40  ;;  %v4962_v21 = vld [vmem:[#allocation81_spill] sm:$0xff]  ;;  %v4967_v40 = vld [vmem:[#allocation16_spill] sm:$0xff] }
 0x59c   :  { %v2173_v23 = vadd.f32 %v2141_v19, %v4959_v14  ;;  %v2142_v45 = vmul.f32 %v2704_v4, %v4960_v52 }
 0x59e   :  { %2205 = vst [vmem:[#allocation2 + $0x90] sm:$0xff] %v2173_v23  ;;  %v2174_v41 = vadd.f32 %v2142_v45, %v4902_v47  ;;  %v2705_v16 = vpop.f32.mrb[104].mxu0 }
 0x59f   :  { %v2706_v50 = vpop.f32.mrb[105].mxu0 }
 0x5a0   :  { %2206 = vst [vmem:[#allocation2 + $0x98] sm:$0xff] %v2174_v41  ;;  %v2707_v2 = vadd.f32 %v2706_v50, %v2705_v16  ;;  %v2708_v42 = vpop.f32.mrb[106].mxu0 }
 0x5a1   :  { %v2709_v63 = vpop.f32.mrb[107].mxu0 }
 0x5a2   :  { %v2143_v43 = vmul.f32 %v2707_v2, %v4905_v24  ;;  %v2710_v32 = vadd.f32 %v2709_v63, %v2708_v42  ;;  %v4964_v24 = vld [vmem:[#allocation83_spill] sm:$0xff] }
 0x5a4   :  { %v2175_v25 = vadd.f32 %v2143_v43, %v4961_v31  ;;  %v2144_v15 = vmul.f32 %v2710_v32, %v4962_v21 }
 0x5a6   :  { %2207 = vst [vmem:[#allocation2 + $0xa0] sm:$0xff] %v2175_v25  ;;  %v2176_v27 = vadd.f32 %v2144_v15, %v4909_v49  ;;  %v2711_v10 = vpop.f32.mrb[108].mxu0 }
 0x5a7   :  { %v2712_v17 = vpop.f32.mrb[109].mxu0 }
 0x5a8   :  { %2208 = vst [vmem:[#allocation2 + $0xa8] sm:$0xff] %v2176_v27  ;;  %v2713_v47 = vadd.f32 %v2712_v17, %v2711_v10  ;;  %v2714_v55 = vpop.f32.mrb[110].mxu0 }
 0x5a9   :  { %v2715_v38 = vpop.f32.mrb[111].mxu0 }
 0x5aa   :  { %v2145_v58 = vmul.f32 %v2713_v47, %v4912_v3  ;;  %v2716_v51 = vadd.f32 %v2715_v38, %v2714_v55  ;;  %v4966_v3 = vld [vmem:[#allocation89_spill] sm:$0xff] }
 0x5ac   :  { %v2177_v5 = vadd.f32 %v2145_v58, %v4963_v33  ;;  %v2146_v54 = vmul.f32 %v2716_v51, %v4964_v24 }
 0x5ae   :  { %2209 = vst [vmem:[#allocation2 + $0xb0] sm:$0xff] %v2177_v5  ;;  %v2178_v61 = vadd.f32 %v2146_v54, %v4916_v36  ;;  %v2717_v0 = vpop.f32.mrb[112].mxu0 }
 0x5af   :  { %v2718_v57 = vpop.f32.mrb[113].mxu0 }
 0x5b0   :  { %2210 = vst [vmem:[#allocation2 + $0xb8] sm:$0xff] %v2178_v61  ;;  %v2719_v49 = vadd.f32 %v2718_v57, %v2717_v0  ;;  %v2720_v29 = vpop.f32.mrb[114].mxu0 }
 0x5b1   :  { %v2721_v46 = vpop.f32.mrb[115].mxu0 }
 0x5b2   :  { %v2147_v60 = vmul.f32 %v2719_v49, %v4919_v44  ;;  %v2722_v59 = vadd.f32 %v2721_v46, %v2720_v29  ;;  %v4968_v44 = vld [vmem:[#allocation95_spill] sm:$0xff] }
 0x5b4   :  { %v2179_v34 = vadd.f32 %v2147_v60, %v4965_v7  ;;  %v2148_v20 = vmul.f32 %v2722_v59, %v4966_v3 }
 0x5b6   :  { %2211 = vst [vmem:[#allocation2 + $0xc0] sm:$0xff] %v2179_v34  ;;  %v2180_v6 = vadd.f32 %v2148_v20, %v4923_v18  ;;  %v2723_v30 = vpop.f32.mrb[116].mxu0 }
 0x5b7   :  { %v2724_v1 = vpop.f32.mrb[117].mxu0 }
 0x5b8   :  { %2212 = vst [vmem:[#allocation2 + $0xc8] sm:$0xff] %v2180_v6  ;;  %v2725_v36 = vadd.f32 %v2724_v1, %v2723_v30  ;;  %v2726_v48 = vpop.f32.mrb[118].mxu0 }
 0x5b9   :  { %v2727_v35 = vpop.f32.mrb[119].mxu0 }
 0x5ba   :  { %v2149_v62 = vmul.f32 %v2725_v36, %v4926_v8  ;;  %v2728_v13 = vadd.f32 %v2727_v35, %v2726_v48 }
 0x5bc   :  { %v2181_v12 = vadd.f32 %v2149_v62, %v4967_v40  ;;  %v2150_v19 = vmul.f32 %v2728_v13, %v4968_v44 }
 0x5be   :  { %2213 = vst [vmem:[#allocation2 + $0xd0] sm:$0xff] %v2181_v12  ;;  %v2182_v4 = vadd.f32 %v2150_v19, %v4930_v22  ;;  %v2729_v14 = vpop.f32.mrb[120].mxu0 }
 0x5bf   :  { %v2730_v23 = vpop.f32.mrb[121].mxu0 }
 0x5c0   :  { %2214 = vst [vmem:[#allocation2 + $0xd8] sm:$0xff] %v2182_v4  ;;  %v2731_v18 = vadd.f32 %v2730_v23, %v2729_v14  ;;  %v2732_v52 = vpop.f32.mrb[122].mxu0 }
 0x5c1   :  { %v2733_v45 = vpop.f32.mrb[123].mxu0 }
 0x5c2   :  { %v2151_v41 = vmul.f32 %v2731_v18, %v4933_v39  ;;  %v2734_v16 = vadd.f32 %v2733_v45, %v2732_v52 }
 0x5c4   :  { %v2183_v50 = vadd.f32 %v2151_v41, %v4934_v9  ;;  %v2152_v8 = vmul.f32 %v2734_v16, %v4935_v53 }
 0x5c6   :  { %2215 = vst [vmem:[#allocation2 + $0xe0] sm:$0xff] %v2183_v50  ;;  %v2184_v2 = vadd.f32 %v2152_v8, %v4937_v26  ;;  %v2735_v42 = vpop.f32.mrb[124].mxu0 }
 0x5c7   :  { %v2736_v63 = vpop.f32.mrb[125].mxu0 }
 0x5c8   :  { %2216 = vst [vmem:[#allocation2 + $0xe8] sm:$0xff] %v2184_v2  ;;  %v2737_v22 = vadd.f32 %v2736_v63, %v2735_v42  ;;  %v2738_v43 = vpop.f32.mrb[126].mxu0 }
 0x5c9   :  { %v2739_v32 = vpop.f32.mrb[127].mxu0 }
 0x5ca   :  { %v2153_v31 = vmul.f32 %v2737_v22, %v4100_v11  ;;  %v2740_v25 = vadd.f32 %v2739_v32, %v2738_v43 }
 0x5cc   :  { %v2185_v39 = vadd.f32 %v2153_v31, %v4140_v37  ;;  %v2154_v9 = vmul.f32 %v2740_v25, %v4126_v28 }
 0x5ce   :  { %2217 = vst [vmem:[#allocation2 + $0xf0] sm:$0xff] %v2185_v39  ;;  %v2186_v53 = vadd.f32 %v2154_v9, %v4152_v56 }
 0x5d0   :  { %2218 = vst [vmem:[#allocation2 + $0xf8] sm:$0xff] %v2186_v53 }
 0x5d1   :  { %2981 = shalt.err (!%p2978_p4)
}
 0x5d2   :  { %s2982_s6 = scalar_lea.hbm %s4543_s8, 4096 }
 0x5d3   :  { %p2983_p5 = scmp.ne.s32.totalorder %s4543_s8, %s2982_s6  ;;  %p2986_p6 = scmp.lt.u32.totalorder %s2982_s6, %s4543_s8 }
 0x5d5   :  { %p2988_p7 = pnand %p2986_p6, %p2983_p5 }
 0x5d7   :  { %2991 = shalt.err (!%p2988_p7)
}
 0x5d8   :  { %s2996_s12 = smov 128   ;;  %s2997_s13 = smov 8  }
 0x5d9   :  { %2230 = dma.vmem_to_hbm [thread:$0]  %s2225_s26, 4096, %s4543_s8, [#allocation3], %s2996_s12, %s2996_s12, %s2997_s13  }
 0x5da   :  { %2992 = dma.done.wait [#allocation3], 4096  }
 0x5db   :  { %2993 = vsyncadd [#allocation3], 4294963200 }
 0x5dc   :  { %2234 = vsyncpa [#allocation3], 1 }

</bundles_post_ra>
